<compile_context>
chip_gen: v7x
topology: tpu7x:2x2x1
jax: 0.10.0
libtpu: 0.0.40
codegen_flags: <defaults>
</compile_context>

<pallas_src>
import functools

import jax
import jax.numpy as jnp
from jax import lax
from jax.experimental import pallas as pl
from jax.experimental.pallas import tpu as pltpu


# ----------------------------- Pallas kernels ------------------------------

def _embed_kernel(p_ref, w_ref, b_ref, cls_ref, pos_ref, o_ref, *, N, S_pad, D):
    """Patch embedding + sequence assembly for one batch element.

    p_ref[0] is (S_pad, C*P*P): row 0 and rows > N are zero (CLS / pad slots),
    rows 1..N hold the flattened patches.  Output row 0 = CLS + pos[0], rows
    1..N = patches @ W + b + pos, remaining rows = pos (zero-padded)."""
    p = p_ref[0].astype(jnp.bfloat16)                                  # (S_pad, CPP)
    emb = jnp.dot(p, w_ref[...], preferred_element_type=jnp.float32)  # (S_pad, D)
    row = lax.broadcasted_iota(jnp.int32, (S_pad, D), 0)
    is_patch = jnp.logical_and(row >= 1, row <= N)
    seq = jnp.where(is_patch, emb + b_ref[...], 0.0)
    seq = seq + jnp.where(row == 0, cls_ref[...], 0.0)
    seq = seq + pos_ref[...]
    o_ref[0] = seq.astype(o_ref.dtype)


def _blocks_kernel(x_ref, g1_ref, b1_ref, qkvw_ref, qkvb_ref, pw_ref, pb_ref,
                   g2_ref, b2_ref, f1w_ref, f1b_ref, f2w_ref, f2b_ref, o_ref,
                   *, heads, Dh, S_real, S_pad, D, B_blk, scale, eps):
    """One pre-norm transformer layer for a tile of B_blk batch elements.

    Grid is (B_tiles, L); the output block index is constant across the layer
    axis, so the activation stays resident in VMEM for all L layers."""
    l = pl.program_id(1)

    @pl.when(l == 0)
    def _():
        o_ref[...] = x_ref[...]

    M = B_blk * S_pad
    x = o_ref[...].reshape(M, D).astype(jnp.float32)

    def ln(v, g, b):
        mu = jnp.mean(v, axis=-1, keepdims=True)
        var = jnp.mean(jnp.square(v - mu), axis=-1, keepdims=True)
        return (v - mu) * lax.rsqrt(var + eps) * g + b

    def mm(a, w, b):
        # bf16 MXU operands, f32 accumulate, f32 epilogue.
        return jnp.dot(a.astype(jnp.bfloat16), w,
                       preferred_element_type=jnp.float32) + b

    # ---------------- multi-head self-attention ----------------
    h = ln(x, g1_ref[0], b1_ref[0])
    qkv = mm(h, qkvw_ref[0], qkvb_ref[0])                 # (M, 3D) f32
    q = qkv[:, 0:D] * scale                               # scale folded into q
    k = qkv[:, D:2 * D]
    v = qkv[:, 2 * D:3 * D]

    if S_pad > S_real:
        col = lax.broadcasted_iota(jnp.int32, (S_pad, S_pad), 1)
        key_mask = jnp.where(col >= S_real, -1e30, 0.0).astype(jnp.float32)
    else:
        key_mask = None

    pw = pw_ref[0]                                        # (D, D) bf16
    attn_tiles = []
    for b in range(B_blk):                                # static unroll over batch tile
        r0 = b * S_pad
        acc = jnp.zeros((S_pad, D), jnp.float32)
        for hh in range(heads):                           # static unroll over heads
            lo = hh * Dh
            # TODO(synk): sub-128-lane head slices force lane retiles; restructure to
            # head-major QKV layout if a bundle dump shows them outside MXU slack.
            qh = q[r0:r0 + S_pad, lo:lo + Dh].astype(jnp.bfloat16)
            kh = k[r0:r0 + S_pad, lo:lo + Dh].astype(jnp.bfloat16)
            vh = v[r0:r0 + S_pad, lo:lo + Dh].astype(jnp.bfloat16)
            # q @ k^T without materializing a transposed tile.
            s = lax.dot_general(qh, kh, (((1,), (1,)), ((), ())),
                                preferred_element_type=jnp.float32)   # (S_pad, S_pad)
            if key_mask is not None:
                s = s + key_mask                          # mask padded key positions
            m = jnp.max(s, axis=-1, keepdims=True)
            p = jnp.exp(s - m)
            denom = jnp.sum(p, axis=-1, keepdims=True)
            p = p * pl.reciprocal(denom, approx=True)     # EUP, not VALU divide
            oh = jnp.dot(p.astype(jnp.bfloat16), vh,
                         preferred_element_type=jnp.float32)          # (S_pad, Dh)
            # Fold the output projection into the head loop:
            #   concat_h(oh) @ proj_w == sum_h oh @ proj_w[h*Dh:(h+1)*Dh, :]
            acc = acc + jnp.dot(oh.astype(jnp.bfloat16), pw[lo:lo + Dh, :],
                                preferred_element_type=jnp.float32)
        attn_tiles.append(acc)
    attn = attn_tiles[0] if B_blk == 1 else jnp.concatenate(attn_tiles, axis=0)
    x = x + attn + pb_ref[0]                              # residual (+ proj bias)

    # ---------------- MLP ----------------
    h = ln(x, g2_ref[0], b2_ref[0])
    # TODO(synk): HF ViT uses exact (erf) GELU; tanh-approx used here (EUP-friendly).
    h = jax.nn.gelu(mm(h, f1w_ref[0], f1b_ref[0]), approximate=True)
    x = x + mm(h, f2w_ref[0], f2b_ref[0])

    o_ref[...] = x.reshape(B_blk, S_pad, D).astype(o_ref.dtype)


def _pool_heads_kernel(x_ref, g_ref, b_ref, pw_ref, pb_ref, hw_ref, hb_ref,
                       o_ref, *, eps):
    """Final LN (CLS rows) -> tanh pooler -> fused 4-head classifier (lane-dense)."""
    x = x_ref[...].astype(jnp.float32)                    # (B, D)
    mu = jnp.mean(x, axis=-1, keepdims=True)
    var = jnp.mean(jnp.square(x - mu), axis=-1, keepdims=True)
    h = (x - mu) * lax.rsqrt(var + eps) * g_ref[...] + b_ref[...]
    feat = jnp.tanh(jnp.dot(h.astype(jnp.bfloat16), pw_ref[...],
                            preferred_element_type=jnp.float32) + pb_ref[...])
    logits = jnp.dot(feat.astype(jnp.bfloat16), hw_ref[...],
                     preferred_element_type=jnp.float32) + hb_ref[...]
    o_ref[...] = logits.astype(o_ref.dtype)               # (B, 128) lane-dense store


# ------------------------------ wrappers ------------------------------------

def embed_sequence(patches_padded, params, *, N, S_pad):
    """patches_padded: (B, S_pad, C*P*P) with CLS/pad rows zeroed."""
    B = patches_padded.shape[0]
    CPP = patches_padded.shape[2]
    D = params["patch_b"].shape[0]
    kernel = functools.partial(_embed_kernel, N=N, S_pad=S_pad, D=D)

    def rep(a):  # replicated operand: same block for every grid step
        return pl.BlockSpec(a.shape, lambda b, _nd=a.ndim: (0,) * _nd)

    args = [params["patch_w"], params["patch_b"].reshape(1, D),
            params["cls"].reshape(1, D), params["pos"]]
    return pl.pallas_call(
        kernel,
        grid=(B,),
        out_shape=jax.ShapeDtypeStruct((B, S_pad, D), jnp.float32),
        in_specs=[pl.BlockSpec((1, S_pad, CPP), lambda b: (b, 0, 0))]
                 + [rep(a) for a in args],
        out_specs=pl.BlockSpec((1, S_pad, D), lambda b: (b, 0, 0)),
        compiler_params=pltpu.CompilerParams(dimension_semantics=("parallel",)),
    )(patches_padded, *args)


def transformer_blocks(x, params, *, heads, S_real, B_blk, eps=1e-12):
    """All L layers in one pallas_call; activation resident in VMEM across layers."""
    B, S_pad, D = x.shape
    L = params["qkv_w"].shape[0]
    Dh = D // heads

    B_tiles = pl.cdiv(B, B_blk)
    B_pad = B_tiles * B_blk
    if B_pad != B:
        x = jnp.pad(x, ((0, B_pad - B), (0, 0), (0, 0)))

    kernel = functools.partial(
        _blocks_kernel, heads=heads, Dh=Dh, S_real=S_real, S_pad=S_pad, D=D,
        B_blk=B_blk, scale=1.0 / (Dh ** 0.5), eps=eps)

    def wspec(a):
        # Stacked per-layer weights: select layer l along axis 0 (prefetched by
        # the BlockSpec pipeline while the previous layer computes).
        return pl.BlockSpec((1,) + a.shape[1:],
                            lambda b, l, _nd=a.ndim: (l,) + (0,) * (_nd - 1))

    wargs = [params["ln1_g"], params["ln1_b"],
             params["qkv_w"], params["qkv_b"],
             params["proj_w"], params["proj_b"],
             params["ln2_g"], params["ln2_b"],
             params["fc1_w"], params["fc1_b"],
             params["fc2_w"], params["fc2_b"]]

    out = pl.pallas_call(
        kernel,
        grid=(B_tiles, L),
        out_shape=jax.ShapeDtypeStruct((B_pad, S_pad, D), jnp.float32),
        in_specs=[pl.BlockSpec((B_blk, S_pad, D), lambda b, l: (b, 0, 0))]
                 + [wspec(a) for a in wargs],
        out_specs=pl.BlockSpec((B_blk, S_pad, D), lambda b, l: (b, 0, 0)),
        compiler_params=pltpu.CompilerParams(
            dimension_semantics=("parallel", "arbitrary")),
    )(x, *wargs)
    return out[:B]


def pool_and_heads(cls_tok, params, eps=1e-12):
    B, D = cls_tok.shape
    HPAD = params["heads_w"].shape[1]
    kernel = functools.partial(_pool_heads_kernel, eps=eps)
    args = (cls_tok,
            params["lnf_g"].reshape(1, D), params["lnf_b"].reshape(1, D),
            params["pool_w"], params["pool_b"].reshape(1, D),
            params["heads_w"], params["heads_b"].reshape(1, HPAD))
    return pl.pallas_call(
        kernel,
        out_shape=jax.ShapeDtypeStruct((B, HPAD), jnp.float32),
        in_specs=[pl.BlockSpec(memory_space=pltpu.MemorySpace.VMEM)] * len(args),
        out_specs=pl.BlockSpec(memory_space=pltpu.MemorySpace.VMEM),
    )(*args)


# ------------------------ parameter init & forward -------------------------

def init_params(key, *, C, P, D, L, heads, mlp, K, S_real, S_pad, hpad=128):
    def nrm(k, shape, scale=0.02, dtype=jnp.float32):
        return (scale * jax.random.normal(k, shape, jnp.float32)).astype(dtype)

    keys = iter(jax.random.split(key, 16))
    params = {
        # Conv2d(C, D, kernel=P, stride=P) flattened to a matmul weight, bf16.
        "patch_w": nrm(next(keys), (C * P * P, D), dtype=jnp.bfloat16),
        "patch_b": jnp.zeros((D,), jnp.float32),
        "cls": nrm(next(keys), (1, D)),
        "pos": jnp.pad(nrm(next(keys), (S_real, D)),
                       ((0, S_pad - S_real), (0, 0))),          # pad rows zero
        "lnf_g": jnp.ones((D,), jnp.float32),
        "lnf_b": jnp.zeros((D,), jnp.float32),
        "pool_w": nrm(next(keys), (D, D), dtype=jnp.bfloat16),
        "pool_b": jnp.zeros((D,), jnp.float32),
        # Stacked per-layer transformer weights (layer axis first).
        "ln1_g": jnp.ones((L, 1, D), jnp.float32),
        "ln1_b": jnp.zeros((L, 1, D), jnp.float32),
        "qkv_w": nrm(next(keys), (L, D, 3 * D), dtype=jnp.bfloat16),
        "qkv_b": jnp.zeros((L, 1, 3 * D), jnp.float32),
        "proj_w": nrm(next(keys), (L, D, D), dtype=jnp.bfloat16),
        "proj_b": jnp.zeros((L, 1, D), jnp.float32),
        "ln2_g": jnp.ones((L, 1, D), jnp.float32),
        "ln2_b": jnp.zeros((L, 1, D), jnp.float32),
        "fc1_w": nrm(next(keys), (L, D, mlp), dtype=jnp.bfloat16),
        "fc1_b": jnp.zeros((L, 1, mlp), jnp.float32),
        "fc2_w": nrm(next(keys), (L, mlp, D), dtype=jnp.bfloat16),
        "fc2_b": jnp.zeros((L, 1, D), jnp.float32),
    }
    # Four classification heads (fc1..fc4, each (D, K)) fused into one
    # lane-dense (D, hpad) matmul; zero columns beyond 4*K are padding.
    hw = jnp.concatenate([nrm(next(keys), (D, K)) for _ in range(4)], axis=1)
    params["heads_w"] = jnp.pad(hw, ((0, 0), (0, hpad - 4 * K))).astype(jnp.bfloat16)
    params["heads_b"] = jnp.zeros((hpad,), jnp.float32)
    return params


def choose_batch_tile(B, S_pad, target_rows=128):
    """Target ~target_rows MXU rows per step, but keep >=2 parallel grid steps
    (v7x has 2 TensorCores) whenever B >= 2."""
    b_blk = max(1, min(B, target_rows // S_pad))
    if B >= 2 and -(-B // b_blk) < 2:
        b_blk = max(1, B // 2)
    return b_blk


def digits_vit_forward(params, img, *, P, heads, S_real, S_pad, K, B_blk):
    B, C, H, W = img.shape
    nH, nW = H // P, W // P
    N = nH * nW

    # Patch extraction (XLA; minor at 32x32 -- see TODO at top for 224x224).
    patches = (img.reshape(B, C, nH, P, nW, P)
                  .transpose(0, 2, 4, 1, 3, 5)
                  .reshape(B, N, C * P * P))
    # Shift patches to rows 1..N; row 0 (CLS slot) and pad rows are zero.
    patches = jnp.pad(patches, ((0, 0), (1, S_pad - 1 - N), (0, 0)))

    # Fused patch-embed + sequence assembly -> (B, S_pad, D).
    x = embed_sequence(patches, params, N=N, S_pad=S_pad)

    # All transformer layers in one fused pallas_call.
    x = transformer_blocks(x, params, heads=heads, S_real=S_real, B_blk=B_blk)

    # Final LN is row-wise -> only the CLS rows are needed downstream.
    cls_tok = x[:, 0, :]                                               # (B, D)
    logits = pool_and_heads(cls_tok, params)                           # (B, 128)
    return tuple(logits[:, i * K:(i + 1) * K] for i in range(4))


# ---------------------------------- main -----------------------------------

if __name__ == "__main__":
    # Small synthetic config (ViT-base is 224/16/768/12x12; scaled down, but with
    # lane-aligned hidden dims: D=128, mlp=256, Dh=32).
    B, C, Himg, Wimg = 2, 3, 32, 32
    P, D, heads, L, mlp, K = 8, 128, 4, 2, 256, 11
    N = (Himg // P) * (Wimg // P)
    S = N + 1                       # 17 tokens (CLS + patches)
    S_pad = ((S + 7) // 8) * 8      # sublane-align the token axis -> 24
    B_blk = choose_batch_tile(B, S_pad)

    key = jax.random.PRNGKey(0)
    k_img, k_par = jax.random.split(key)
    img = jax.random.normal(k_img, (B, C, Himg, Wimg), jnp.float32)
    params = init_params(k_par, C=C, P=P, D=D, L=L, heads=heads, mlp=mlp,
                         K=K, S_real=S, S_pad=S_pad)

    fwd = jax.jit(functools.partial(digits_vit_forward, P=P, heads=heads,
                                    S_real=S, S_pad=S_pad, K=K, B_blk=B_blk))
    c1, c2, c3, c4 = fwd(params, img)
    jax.block_until_ready((c1, c2, c3, c4))

    assert c1.shape == (B, K) and c2.shape == (B, K)
    assert c3.shape == (B, K) and c4.shape == (B, K)
    print("KERNEL_OK")
</pallas_src>

<mosaic_0001>
module attributes {stable_mosaic.version = 11 : i64} {
  func.func @_embed_kernel(%arg0: i32, %arg1: memref<1x24x192xf32, #tpu.memory_space<vmem>>, %arg2: memref<192x128xbf16, #tpu.memory_space<vmem>>, %arg3: memref<1x128xf32, #tpu.memory_space<vmem>>, %arg4: memref<1x128xf32, #tpu.memory_space<vmem>>, %arg5: memref<24x128xf32, #tpu.memory_space<vmem>>, %arg6: memref<1x24x128xf32, #tpu.memory_space<vmem>>) attributes {dimension_semantics = [#tpu.dimension_semantics<parallel>], iteration_bounds = array<i64: 2>, scalar_prefetch = 0 : i64, scratch_operands = 0 : i64, tpu.core_type = #tpu.core_type<tc>, window_params = [{transform_indices = @transform_0, window_bounds = array<i64: 1, 24, 192>}, {pipeline_mode = #tpu.pipeline_mode<synchronous>, transform_indices = @transform_1, window_bounds = array<i64: 192, 128>}, {pipeline_mode = #tpu.pipeline_mode<synchronous>, transform_indices = @transform_2, window_bounds = array<i64: 1, 128>}, {pipeline_mode = #tpu.pipeline_mode<synchronous>, transform_indices = @transform_3, window_bounds = array<i64: 1, 128>}, {pipeline_mode = #tpu.pipeline_mode<synchronous>, transform_indices = @transform_4, window_bounds = array<i64: 24, 128>}, {transform_indices = @transform_5, window_bounds = array<i64: 1, 24, 128>}]} {
    %c0 = arith.constant 0 : index
    %c0_0 = arith.constant 0 : index
    %c0_1 = arith.constant 0 : index
    %0 = vector.load %arg1[%c0, %c0_0, %c0_1] : memref<1x24x192xf32, #tpu.memory_space<vmem>>, vector<1x24x192xf32>
    %1 = vector.shape_cast %0 : vector<1x24x192xf32> to vector<24x192xf32>
    %2 = arith.truncf %1 : vector<24x192xf32> to vector<24x192xbf16>
    %c0_2 = arith.constant 0 : index
    %c0_3 = arith.constant 0 : index
    %3 = vector.load %arg2[%c0_2, %c0_3] : memref<192x128xbf16, #tpu.memory_space<vmem>>, vector<192x128xbf16>
    %cst = arith.constant dense<0.000000e+00> : vector<24x128xf32>
    %4 = tpu.matmul %2, %3, %cst {dimension_numbers = #tpu.dot_dimension_numbers<[1], [0], [0], [1], [0, 0, 1, 1], [], []>} : vector<24x192xbf16>, vector<192x128xbf16>, vector<24x128xf32> -> vector<24x128xf32>
    %5 = tpu.iota {dimensions = array<i32: 0>} : vector<24x128xi32>
    %c1_i32 = arith.constant 1 : i32
    %6 = vector.broadcast %c1_i32 : i32 to vector<24x128xi32>
    %7 = arith.cmpi sge, %5, %6 : vector<24x128xi32>
    %c16_i32 = arith.constant 16 : i32
    %8 = vector.broadcast %c16_i32 : i32 to vector<24x128xi32>
    %9 = arith.cmpi sle, %5, %8 : vector<24x128xi32>
    %10 = arith.andi %7, %9 : vector<24x128xi1>
    %c0_4 = arith.constant 0 : index
    %c0_5 = arith.constant 0 : index
    %11 = vector.load %arg3[%c0_4, %c0_5] : memref<1x128xf32, #tpu.memory_space<vmem>>, vector<1x128xf32>
    %12 = vector.broadcast %11 : vector<1x128xf32> to vector<24x128xf32>
    %13 = arith.addf %4, %12 : vector<24x128xf32>
    %cst_6 = arith.constant 0.000000e+00 : f32
    %14 = vector.broadcast %cst_6 : f32 to vector<24x128xf32>
    %15 = arith.select %10, %13, %14 : vector<24x128xi1>, vector<24x128xf32>
    %c0_i32 = arith.constant 0 : i32
    %16 = vector.broadcast %c0_i32 : i32 to vector<24x128xi32>
    %17 = arith.cmpi eq, %5, %16 : vector<24x128xi32>
    %c0_7 = arith.constant 0 : index
    %c0_8 = arith.constant 0 : index
    %18 = vector.load %arg4[%c0_7, %c0_8] : memref<1x128xf32, #tpu.memory_space<vmem>>, vector<1x128xf32>
    %cst_9 = arith.constant 0.000000e+00 : f32
    %19 = vector.shape_cast %18 : vector<1x128xf32> to vector<1x128xf32>
    %20 = vector.broadcast %19 : vector<1x128xf32> to vector<24x128xf32>
    %21 = vector.broadcast %cst_9 : f32 to vector<24x128xf32>
    %22 = arith.select %17, %20, %21 : vector<24x128xi1>, vector<24x128xf32>
    %23 = arith.addf %15, %22 : vector<24x128xf32>
    %c0_10 = arith.constant 0 : index
    %c0_11 = arith.constant 0 : index
    %24 = vector.load %arg5[%c0_10, %c0_11] : memref<24x128xf32, #tpu.memory_space<vmem>>, vector<24x128xf32>
    %25 = arith.addf %23, %24 : vector<24x128xf32>
    %c0_12 = arith.constant 0 : index
    %c0_13 = arith.constant 0 : index
    %c0_14 = arith.constant 0 : index
    %26 = vector.load %arg6[%c0_12, %c0_13, %c0_14] : memref<1x24x128xf32, #tpu.memory_space<vmem>>, vector<1x24x128xf32>
    %27 = vector.shape_cast %26 : vector<1x24x128xf32> to vector<24x128xf32>
    %28 = vector.shape_cast %25 : vector<24x128xf32> to vector<1x24x128xf32>
    tpu.vector_store %arg6[%c0_12, %c0_13, %c0_14], %28 {strides = array<i32>} : memref<1x24x128xf32, #tpu.memory_space<vmem>>, vector<1x24x128xf32>,
    return
  }
  func.func @transform_0(%arg0: i32) -> (i32, i32, i32) {
    %c0_i32 = arith.constant 0 : i32
    %c0_i32_0 = arith.constant 0 : i32
    %c0_i32_1 = arith.constant 0 : i32
    return %arg0, %c0_i32, %c0_i32_0 : i32, i32, i32
  }
  func.func @transform_1(%arg0: i32) -> (i32, i32) {
    %c0_i32 = arith.constant 0 : i32
    %c0_i32_0 = arith.constant 0 : i32
    %c0_i32_1 = arith.constant 0 : i32
    return %c0_i32, %c0_i32_0 : i32, i32
  }
  func.func @transform_2(%arg0: i32) -> (i32, i32) {
    %c0_i32 = arith.constant 0 : i32
    %c0_i32_0 = arith.constant 0 : i32
    %c0_i32_1 = arith.constant 0 : i32
    return %c0_i32, %c0_i32_0 : i32, i32
  }
  func.func @transform_3(%arg0: i32) -> (i32, i32) {
    %c0_i32 = arith.constant 0 : i32
    %c0_i32_0 = arith.constant 0 : i32
    %c0_i32_1 = arith.constant 0 : i32
    return %c0_i32, %c0_i32_0 : i32, i32
  }
  func.func @transform_4(%arg0: i32) -> (i32, i32) {
    %c0_i32 = arith.constant 0 : i32
    %c0_i32_0 = arith.constant 0 : i32
    %c0_i32_1 = arith.constant 0 : i32
    return %c0_i32, %c0_i32_0 : i32, i32
  }
  func.func @transform_5(%arg0: i32) -> (i32, i32, i32) {
    %c0_i32 = arith.constant 0 : i32
    %c0_i32_0 = arith.constant 0 : i32
    %c0_i32_1 = arith.constant 0 : i32
    return %arg0, %c0_i32, %c0_i32_0 : i32, i32, i32
  }
}

module attributes {stable_mosaic.version = 11 : i64} {
  func.func @_blocks_kernel(%arg0: i32, %arg1: i32, %arg2: memref<1x24x128xf32, #tpu.memory_space<vmem>>, %arg3: memref<1x1x128xf32, #tpu.memory_space<vmem>>, %arg4: memref<1x1x128xf32, #tpu.memory_space<vmem>>, %arg5: memref<1x128x384xbf16, #tpu.memory_space<vmem>>, %arg6: memref<1x1x384xf32, #tpu.memory_space<vmem>>, %arg7: memref<1x128x128xbf16, #tpu.memory_space<vmem>>, %arg8: memref<1x1x128xf32, #tpu.memory_space<vmem>>, %arg9: memref<1x1x128xf32, #tpu.memory_space<vmem>>, %arg10: memref<1x1x128xf32, #tpu.memory_space<vmem>>, %arg11: memref<1x128x256xbf16, #tpu.memory_space<vmem>>, %arg12: memref<1x1x256xf32, #tpu.memory_space<vmem>>, %arg13: memref<1x256x128xbf16, #tpu.memory_space<vmem>>, %arg14: memref<1x1x128xf32, #tpu.memory_space<vmem>>, %arg15: memref<1x24x128xf32, #tpu.memory_space<vmem>>) attributes {dimension_semantics = [#tpu.dimension_semantics<parallel>, #tpu.dimension_semantics<arbitrary>], iteration_bounds = array<i64: 2, 2>, scalar_prefetch = 0 : i64, scratch_operands = 0 : i64, tpu.core_type = #tpu.core_type<tc>, window_params = [{transform_indices = @transform_0, window_bounds = array<i64: 1, 24, 128>}, {transform_indices = @transform_1, window_bounds = array<i64: 1, 1, 128>}, {transform_indices = @transform_2, window_bounds = array<i64: 1, 1, 128>}, {transform_indices = @transform_3, window_bounds = array<i64: 1, 128, 384>}, {transform_indices = @transform_4, window_bounds = array<i64: 1, 1, 384>}, {transform_indices = @transform_5, window_bounds = array<i64: 1, 128, 128>}, {transform_indices = @transform_6, window_bounds = array<i64: 1, 1, 128>}, {transform_indices = @transform_7, window_bounds = array<i64: 1, 1, 128>}, {transform_indices = @transform_8, window_bounds = array<i64: 1, 1, 128>}, {transform_indices = @transform_9, window_bounds = array<i64: 1, 128, 256>}, {transform_indices = @transform_10, window_bounds = array<i64: 1, 1, 256>}, {transform_indices = @transform_11, window_bounds = array<i64: 1, 256, 128>}, {transform_indices = @transform_12, window_bounds = array<i64: 1, 1, 128>}, {transform_indices = @transform_13, window_bounds = array<i64: 1, 24, 128>}]} {
    %c0_i32 = arith.constant 0 : i32
    %0 = arith.cmpi eq, %arg1, %c0_i32 : i32
    %1 = arith.extui %0 : i1 to i32
    %c0_i32_0 = arith.constant 0 : i32
    %2 = arith.cmpi ne, %1, %c0_i32_0 : i32
    scf.if %2 {
      %c0_82 = arith.constant 0 : index
      %c0_83 = arith.constant 0 : index
      %c0_84 = arith.constant 0 : index
      %212 = vector.load %arg2[%c0_82, %c0_83, %c0_84] : memref<1x24x128xf32, #tpu.memory_space<vmem>>, vector<1x24x128xf32>
      %c0_85 = arith.constant 0 : index
      %c0_86 = arith.constant 0 : index
      %c0_87 = arith.constant 0 : index
      %213 = vector.load %arg15[%c0_85, %c0_86, %c0_87] : memref<1x24x128xf32, #tpu.memory_space<vmem>>, vector<1x24x128xf32>
      tpu.vector_store %arg15[%c0_85, %c0_86, %c0_87], %212 {strides = array<i32>} : memref<1x24x128xf32, #tpu.memory_space<vmem>>, vector<1x24x128xf32>,
    } else {
    }
    %c0 = arith.constant 0 : index
    %c0_1 = arith.constant 0 : index
    %c0_2 = arith.constant 0 : index
    %3 = vector.load %arg15[%c0, %c0_1, %c0_2] : memref<1x24x128xf32, #tpu.memory_space<vmem>>, vector<1x24x128xf32>
    %4 = vector.shape_cast %3 : vector<1x24x128xf32> to vector<24x128xf32>
    %c0_3 = arith.constant 0 : index
    %c0_4 = arith.constant 0 : index
    %c0_5 = arith.constant 0 : index
    %5 = vector.load %arg3[%c0_3, %c0_4, %c0_5] : memref<1x1x128xf32, #tpu.memory_space<vmem>>, vector<1x1x128xf32>
    %6 = vector.shape_cast %5 : vector<1x1x128xf32> to vector<1x128xf32>
    %c0_6 = arith.constant 0 : index
    %c0_7 = arith.constant 0 : index
    %c0_8 = arith.constant 0 : index
    %7 = vector.load %arg4[%c0_6, %c0_7, %c0_8] : memref<1x1x128xf32, #tpu.memory_space<vmem>>, vector<1x1x128xf32>
    %8 = vector.shape_cast %7 : vector<1x1x128xf32> to vector<1x128xf32>
    %cst = arith.constant dense<0.000000e+00> : vector<24xf32>
    %9 = vector.multi_reduction <add>, %4, %cst [1] : vector<24x128xf32> to vector<24xf32>
    %10 = vector.shape_cast %9 : vector<24xf32> to vector<24x1xf32>
    %cst_9 = arith.constant 1.280000e+02 : f32
    %11 = vector.broadcast %cst_9 : f32 to vector<24x1xf32>
    %12 = arith.divf %10, %11 : vector<24x1xf32>
    %13 = vector.broadcast %12 : vector<24x1xf32> to vector<24x128xf32>
    %14 = arith.subf %4, %13 : vector<24x128xf32>
    %15 = arith.mulf %14, %14 : vector<24x128xf32>
    %cst_10 = arith.constant dense<0.000000e+00> : vector<24xf32>
    %16 = vector.multi_reduction <add>, %15, %cst_10 [1] : vector<24x128xf32> to vector<24xf32>
    %17 = vector.shape_cast %16 : vector<24xf32> to vector<24x1xf32>
    %cst_11 = arith.constant 1.280000e+02 : f32
    %18 = vector.broadcast %cst_11 : f32 to vector<24x1xf32>
    %19 = arith.divf %17, %18 : vector<24x1xf32>
    %20 = vector.broadcast %12 : vector<24x1xf32> to vector<24x128xf32>
    %21 = arith.subf %4, %20 : vector<24x128xf32>
    %cst_12 = arith.constant 9.99999996E-13 : f32
    %22 = vector.broadcast %cst_12 : f32 to vector<24x1xf32>
    %23 = arith.addf %19, %22 : vector<24x1xf32>
    %24 = math.rsqrt %23 : vector<24x1xf32>
    %25 = vector.broadcast %24 : vector<24x1xf32> to vector<24x128xf32>
    %26 = arith.mulf %21, %25 : vector<24x128xf32>
    %27 = vector.broadcast %6 : vector<1x128xf32> to vector<24x128xf32>
    %28 = arith.mulf %26, %27 : vector<24x128xf32>
    %29 = vector.broadcast %8 : vector<1x128xf32> to vector<24x128xf32>
    %30 = arith.addf %28, %29 : vector<24x128xf32>
    %c0_13 = arith.constant 0 : index
    %c0_14 = arith.constant 0 : index
    %c0_15 = arith.constant 0 : index
    %31 = vector.load %arg5[%c0_13, %c0_14, %c0_15] : memref<1x128x384xbf16, #tpu.memory_space<vmem>>, vector<1x128x384xbf16>
    %32 = vector.shape_cast %31 : vector<1x128x384xbf16> to vector<128x384xbf16>
    %c0_16 = arith.constant 0 : index
    %c0_17 = arith.constant 0 : index
    %c0_18 = arith.constant 0 : index
    %33 = vector.load %arg6[%c0_16, %c0_17, %c0_18] : memref<1x1x384xf32, #tpu.memory_space<vmem>>, vector<1x1x384xf32>
    %34 = vector.shape_cast %33 : vector<1x1x384xf32> to vector<1x384xf32>
    %35 = arith.truncf %30 : vector<24x128xf32> to vector<24x128xbf16>
    %cst_19 = arith.constant dense<0.000000e+00> : vector<24x384xf32>
    %36 = tpu.matmul %35, %32, %cst_19 {dimension_numbers = #tpu.dot_dimension_numbers<[1], [0], [0], [1], [0, 0, 1, 1], [], []>} : vector<24x128xbf16>, vector<128x384xbf16>, vector<24x384xf32> -> vector<24x384xf32>
    %37 = vector.broadcast %34 : vector<1x384xf32> to vector<24x384xf32>
    %38 = arith.addf %36, %37 : vector<24x384xf32>
    %39 = vector.extract_strided_slice %38 {offsets = [0, 0], sizes = [24, 128], strides = [1, 1]} : vector<24x384xf32> to vector<24x128xf32>
    %cst_20 = arith.constant 0.176776692 : f32
    %40 = vector.broadcast %cst_20 : f32 to vector<24x128xf32>
    %41 = arith.mulf %39, %40 : vector<24x128xf32>
    %42 = vector.extract_strided_slice %38 {offsets = [0, 128], sizes = [24, 128], strides = [1, 1]} : vector<24x384xf32> to vector<24x128xf32>
    %43 = vector.extract_strided_slice %38 {offsets = [0, 256], sizes = [24, 128], strides = [1, 1]} : vector<24x384xf32> to vector<24x128xf32>
    %44 = tpu.iota {dimensions = array<i32: 1>} : vector<24x24xi32>
    %c17_i32 = arith.constant 17 : i32
    %45 = vector.broadcast %c17_i32 : i32 to vector<24x24xi32>
    %46 = arith.cmpi sge, %44, %45 : vector<24x24xi32>
    %cst_21 = arith.constant -1.000000e+30 : f32
    %cst_22 = arith.constant 0.000000e+00 : f32
    %47 = vector.broadcast %cst_21 : f32 to vector<24x24xf32>
    %48 = vector.broadcast %cst_22 : f32 to vector<24x24xf32>
    %49 = arith.select %46, %47, %48 : vector<24x24xi1>, vector<24x24xf32>
    %c0_23 = arith.constant 0 : index
    %c0_24 = arith.constant 0 : index
    %c0_25 = arith.constant 0 : index
    %50 = vector.load %arg7[%c0_23, %c0_24, %c0_25] : memref<1x128x128xbf16, #tpu.memory_space<vmem>>, vector<1x128x128xbf16>
    %51 = vector.shape_cast %50 : vector<1x128x128xbf16> to vector<128x128xbf16>
    %cst_26 = arith.constant 0.000000e+00 : f32
    %52 = vector.broadcast %cst_26 : f32 to vector<24x128xf32>
    %53 = vector.extract_strided_slice %41 {offsets = [0, 0], sizes = [24, 32], strides = [1, 1]} : vector<24x128xf32> to vector<24x32xf32>
    %54 = arith.truncf %53 : vector<24x32xf32> to vector<24x32xbf16>
    %55 = vector.extract_strided_slice %42 {offsets = [0, 0], sizes = [24, 32], strides = [1, 1]} : vector<24x128xf32> to vector<24x32xf32>
    %56 = arith.truncf %55 : vector<24x32xf32> to vector<24x32xbf16>
    %57 = vector.extract_strided_slice %43 {offsets = [0, 0], sizes = [24, 32], strides = [1, 1]} : vector<24x128xf32> to vector<24x32xf32>
    %58 = arith.truncf %57 : vector<24x32xf32> to vector<24x32xbf16>
    %cst_27 = arith.constant dense<0.000000e+00> : vector<24x24xf32>
    %59 = tpu.matmul %54, %56, %cst_27 {dimension_numbers = #tpu.dot_dimension_numbers<[1], [1], [0], [0], [0, 0, 1, 0], [], []>} : vector<24x32xbf16>, vector<24x32xbf16>, vector<24x24xf32> -> vector<24x24xf32>
    %60 = arith.addf %59, %49 : vector<24x24xf32>
    %cst_28 = arith.constant dense<0xFF800000> : vector<24xf32>
    %61 = vector.multi_reduction <maximumf>, %60, %cst_28 [1] : vector<24x24xf32> to vector<24xf32>
    %62 = vector.shape_cast %61 : vector<24xf32> to vector<24x1xf32>
    %63 = vector.broadcast %62 : vector<24x1xf32> to vector<24x24xf32>
    %64 = arith.subf %60, %63 : vector<24x24xf32>
    %65 = math.exp %64 : vector<24x24xf32>
    %cst_29 = arith.constant dense<0.000000e+00> : vector<24xf32>
    %66 = vector.multi_reduction <add>, %65, %cst_29 [1] : vector<24x24xf32> to vector<24xf32>
    %67 = vector.shape_cast %66 : vector<24xf32> to vector<24x1xf32>
    %68 = tpu.reciprocal %67 {approx = true} : vector<24x1xf32> -> vector<24x1xf32>
    %69 = vector.broadcast %68 : vector<24x1xf32> to vector<24x24xf32>
    %70 = arith.mulf %65, %69 : vector<24x24xf32>
    %71 = arith.truncf %70 : vector<24x24xf32> to vector<24x24xbf16>
    %cst_30 = arith.constant dense<0.000000e+00> : vector<24x32xf32>
    %72 = tpu.matmul %71, %58, %cst_30 {dimension_numbers = #tpu.dot_dimension_numbers<[1], [0], [0], [1], [0, 0, 1, 1], [], []>} : vector<24x24xbf16>, vector<24x32xbf16>, vector<24x32xf32> -> vector<24x32xf32>
    %73 = arith.truncf %72 : vector<24x32xf32> to vector<24x32xbf16>
    %74 = vector.extract_strided_slice %51 {offsets = [0, 0], sizes = [32, 128], strides = [1, 1]} : vector<128x128xbf16> to vector<32x128xbf16>
    %cst_31 = arith.constant dense<0.000000e+00> : vector<24x128xf32>
    %75 = tpu.matmul %73, %74, %cst_31 {dimension_numbers = #tpu.dot_dimension_numbers<[1], [0], [0], [1], [0, 0, 1, 1], [], []>} : vector<24x32xbf16>, vector<32x128xbf16>, vector<24x128xf32> -> vector<24x128xf32>
    %76 = arith.addf %52, %75 : vector<24x128xf32>
    %77 = vector.extract_strided_slice %41 {offsets = [0, 32], sizes = [24, 32], strides = [1, 1]} : vector<24x128xf32> to vector<24x32xf32>
    %78 = arith.truncf %77 : vector<24x32xf32> to vector<24x32xbf16>
    %79 = vector.extract_strided_slice %42 {offsets = [0, 32], sizes = [24, 32], strides = [1, 1]} : vector<24x128xf32> to vector<24x32xf32>
    %80 = arith.truncf %79 : vector<24x32xf32> to vector<24x32xbf16>
    %81 = vector.extract_strided_slice %43 {offsets = [0, 32], sizes = [24, 32], strides = [1, 1]} : vector<24x128xf32> to vector<24x32xf32>
    %82 = arith.truncf %81 : vector<24x32xf32> to vector<24x32xbf16>
    %cst_32 = arith.constant dense<0.000000e+00> : vector<24x24xf32>
    %83 = tpu.matmul %78, %80, %cst_32 {dimension_numbers = #tpu.dot_dimension_numbers<[1], [1], [0], [0], [0, 0, 1, 0], [], []>} : vector<24x32xbf16>, vector<24x32xbf16>, vector<24x24xf32> -> vector<24x24xf32>
    %84 = arith.addf %83, %49 : vector<24x24xf32>
    %cst_33 = arith.constant dense<0xFF800000> : vector<24xf32>
    %85 = vector.multi_reduction <maximumf>, %84, %cst_33 [1] : vector<24x24xf32> to vector<24xf32>
    %86 = vector.shape_cast %85 : vector<24xf32> to vector<24x1xf32>
    %87 = vector.broadcast %86 : vector<24x1xf32> to vector<24x24xf32>
    %88 = arith.subf %84, %87 : vector<24x24xf32>
    %89 = math.exp %88 : vector<24x24xf32>
    %cst_34 = arith.constant dense<0.000000e+00> : vector<24xf32>
    %90 = vector.multi_reduction <add>, %89, %cst_34 [1] : vector<24x24xf32> to vector<24xf32>
    %91 = vector.shape_cast %90 : vector<24xf32> to vector<24x1xf32>
    %92 = tpu.reciprocal %91 {approx = true} : vector<24x1xf32> -> vector<24x1xf32>
    %93 = vector.broadcast %92 : vector<24x1xf32> to vector<24x24xf32>
    %94 = arith.mulf %89, %93 : vector<24x24xf32>
    %95 = arith.truncf %94 : vector<24x24xf32> to vector<24x24xbf16>
    %cst_35 = arith.constant dense<0.000000e+00> : vector<24x32xf32>
    %96 = tpu.matmul %95, %82, %cst_35 {dimension_numbers = #tpu.dot_dimension_numbers<[1], [0], [0], [1], [0, 0, 1, 1], [], []>} : vector<24x24xbf16>, vector<24x32xbf16>, vector<24x32xf32> -> vector<24x32xf32>
    %97 = arith.truncf %96 : vector<24x32xf32> to vector<24x32xbf16>
    %98 = vector.extract_strided_slice %51 {offsets = [32, 0], sizes = [32, 128], strides = [1, 1]} : vector<128x128xbf16> to vector<32x128xbf16>
    %cst_36 = arith.constant dense<0.000000e+00> : vector<24x128xf32>
    %99 = tpu.matmul %97, %98, %cst_36 {dimension_numbers = #tpu.dot_dimension_numbers<[1], [0], [0], [1], [0, 0, 1, 1], [], []>} : vector<24x32xbf16>, vector<32x128xbf16>, vector<24x128xf32> -> vector<24x128xf32>
    %100 = arith.addf %76, %99 : vector<24x128xf32>
    %101 = vector.extract_strided_slice %41 {offsets = [0, 64], sizes = [24, 32], strides = [1, 1]} : vector<24x128xf32> to vector<24x32xf32>
    %102 = arith.truncf %101 : vector<24x32xf32> to vector<24x32xbf16>
    %103 = vector.extract_strided_slice %42 {offsets = [0, 64], sizes = [24, 32], strides = [1, 1]} : vector<24x128xf32> to vector<24x32xf32>
    %104 = arith.truncf %103 : vector<24x32xf32> to vector<24x32xbf16>
    %105 = vector.extract_strided_slice %43 {offsets = [0, 64], sizes = [24, 32], strides = [1, 1]} : vector<24x128xf32> to vector<24x32xf32>
    %106 = arith.truncf %105 : vector<24x32xf32> to vector<24x32xbf16>
    %cst_37 = arith.constant dense<0.000000e+00> : vector<24x24xf32>
    %107 = tpu.matmul %102, %104, %cst_37 {dimension_numbers = #tpu.dot_dimension_numbers<[1], [1], [0], [0], [0, 0, 1, 0], [], []>} : vector<24x32xbf16>, vector<24x32xbf16>, vector<24x24xf32> -> vector<24x24xf32>
    %108 = arith.addf %107, %49 : vector<24x24xf32>
    %cst_38 = arith.constant dense<0xFF800000> : vector<24xf32>
    %109 = vector.multi_reduction <maximumf>, %108, %cst_38 [1] : vector<24x24xf32> to vector<24xf32>
    %110 = vector.shape_cast %109 : vector<24xf32> to vector<24x1xf32>
    %111 = vector.broadcast %110 : vector<24x1xf32> to vector<24x24xf32>
    %112 = arith.subf %108, %111 : vector<24x24xf32>
    %113 = math.exp %112 : vector<24x24xf32>
    %cst_39 = arith.constant dense<0.000000e+00> : vector<24xf32>
    %114 = vector.multi_reduction <add>, %113, %cst_39 [1] : vector<24x24xf32> to vector<24xf32>
    %115 = vector.shape_cast %114 : vector<24xf32> to vector<24x1xf32>
    %116 = tpu.reciprocal %115 {approx = true} : vector<24x1xf32> -> vector<24x1xf32>
    %117 = vector.broadcast %116 : vector<24x1xf32> to vector<24x24xf32>
    %118 = arith.mulf %113, %117 : vector<24x24xf32>
    %119 = arith.truncf %118 : vector<24x24xf32> to vector<24x24xbf16>
    %cst_40 = arith.constant dense<0.000000e+00> : vector<24x32xf32>
    %120 = tpu.matmul %119, %106, %cst_40 {dimension_numbers = #tpu.dot_dimension_numbers<[1], [0], [0], [1], [0, 0, 1, 1], [], []>} : vector<24x24xbf16>, vector<24x32xbf16>, vector<24x32xf32> -> vector<24x32xf32>
    %121 = arith.truncf %120 : vector<24x32xf32> to vector<24x32xbf16>
    %122 = vector.extract_strided_slice %51 {offsets = [64, 0], sizes = [32, 128], strides = [1, 1]} : vector<128x128xbf16> to vector<32x128xbf16>
    %cst_41 = arith.constant dense<0.000000e+00> : vector<24x128xf32>
    %123 = tpu.matmul %121, %122, %cst_41 {dimension_numbers = #tpu.dot_dimension_numbers<[1], [0], [0], [1], [0, 0, 1, 1], [], []>} : vector<24x32xbf16>, vector<32x128xbf16>, vector<24x128xf32> -> vector<24x128xf32>
    %124 = arith.addf %100, %123 : vector<24x128xf32>
    %125 = vector.extract_strided_slice %41 {offsets = [0, 96], sizes = [24, 32], strides = [1, 1]} : vector<24x128xf32> to vector<24x32xf32>
    %126 = arith.truncf %125 : vector<24x32xf32> to vector<24x32xbf16>
    %127 = vector.extract_strided_slice %42 {offsets = [0, 96], sizes = [24, 32], strides = [1, 1]} : vector<24x128xf32> to vector<24x32xf32>
    %128 = arith.truncf %127 : vector<24x32xf32> to vector<24x32xbf16>
    %129 = vector.extract_strided_slice %43 {offsets = [0, 96], sizes = [24, 32], strides = [1, 1]} : vector<24x128xf32> to vector<24x32xf32>
    %130 = arith.truncf %129 : vector<24x32xf32> to vector<24x32xbf16>
    %cst_42 = arith.constant dense<0.000000e+00> : vector<24x24xf32>
    %131 = tpu.matmul %126, %128, %cst_42 {dimension_numbers = #tpu.dot_dimension_numbers<[1], [1], [0], [0], [0, 0, 1, 0], [], []>} : vector<24x32xbf16>, vector<24x32xbf16>, vector<24x24xf32> -> vector<24x24xf32>
    %132 = arith.addf %131, %49 : vector<24x24xf32>
    %cst_43 = arith.constant dense<0xFF800000> : vector<24xf32>
    %133 = vector.multi_reduction <maximumf>, %132, %cst_43 [1] : vector<24x24xf32> to vector<24xf32>
    %134 = vector.shape_cast %133 : vector<24xf32> to vector<24x1xf32>
    %135 = vector.broadcast %134 : vector<24x1xf32> to vector<24x24xf32>
    %136 = arith.subf %132, %135 : vector<24x24xf32>
    %137 = math.exp %136 : vector<24x24xf32>
    %cst_44 = arith.constant dense<0.000000e+00> : vector<24xf32>
    %138 = vector.multi_reduction <add>, %137, %cst_44 [1] : vector<24x24xf32> to vector<24xf32>
    %139 = vector.shape_cast %138 : vector<24xf32> to vector<24x1xf32>
    %140 = tpu.reciprocal %139 {approx = true} : vector<24x1xf32> -> vector<24x1xf32>
    %141 = vector.broadcast %140 : vector<24x1xf32> to vector<24x24xf32>
    %142 = arith.mulf %137, %141 : vector<24x24xf32>
    %143 = arith.truncf %142 : vector<24x24xf32> to vector<24x24xbf16>
    %cst_45 = arith.constant dense<0.000000e+00> : vector<24x32xf32>
    %144 = tpu.matmul %143, %130, %cst_45 {dimension_numbers = #tpu.dot_dimension_numbers<[1], [0], [0], [1], [0, 0, 1, 1], [], []>} : vector<24x24xbf16>, vector<24x32xbf16>, vector<24x32xf32> -> vector<24x32xf32>
    %145 = arith.truncf %144 : vector<24x32xf32> to vector<24x32xbf16>
    %146 = vector.extract_strided_slice %51 {offsets = [96, 0], sizes = [32, 128], strides = [1, 1]} : vector<128x128xbf16> to vector<32x128xbf16>
    %cst_46 = arith.constant dense<0.000000e+00> : vector<24x128xf32>
    %147 = tpu.matmul %145, %146, %cst_46 {dimension_numbers = #tpu.dot_dimension_numbers<[1], [0], [0], [1], [0, 0, 1, 1], [], []>} : vector<24x32xbf16>, vector<32x128xbf16>, vector<24x128xf32> -> vector<24x128xf32>
    %148 = arith.addf %124, %147 : vector<24x128xf32>
    %149 = arith.addf %4, %148 : vector<24x128xf32>
    %c0_47 = arith.constant 0 : index
    %c0_48 = arith.constant 0 : index
    %c0_49 = arith.constant 0 : index
    %150 = vector.load %arg8[%c0_47, %c0_48, %c0_49] : memref<1x1x128xf32, #tpu.memory_space<vmem>>, vector<1x1x128xf32>
    %151 = vector.shape_cast %150 : vector<1x1x128xf32> to vector<1x128xf32>
    %152 = vector.broadcast %151 : vector<1x128xf32> to vector<24x128xf32>
    %153 = arith.addf %149, %152 : vector<24x128xf32>
    %c0_50 = arith.constant 0 : index
    %c0_51 = arith.constant 0 : index
    %c0_52 = arith.constant 0 : index
    %154 = vector.load %arg9[%c0_50, %c0_51, %c0_52] : memref<1x1x128xf32, #tpu.memory_space<vmem>>, vector<1x1x128xf32>
    %155 = vector.shape_cast %154 : vector<1x1x128xf32> to vector<1x128xf32>
    %c0_53 = arith.constant 0 : index
    %c0_54 = arith.constant 0 : index
    %c0_55 = arith.constant 0 : index
    %156 = vector.load %arg10[%c0_53, %c0_54, %c0_55] : memref<1x1x128xf32, #tpu.memory_space<vmem>>, vector<1x1x128xf32>
    %157 = vector.shape_cast %156 : vector<1x1x128xf32> to vector<1x128xf32>
    %cst_56 = arith.constant dense<0.000000e+00> : vector<24xf32>
    %158 = vector.multi_reduction <add>, %153, %cst_56 [1] : vector<24x128xf32> to vector<24xf32>
    %159 = vector.shape_cast %158 : vector<24xf32> to vector<24x1xf32>
    %cst_57 = arith.constant 1.280000e+02 : f32
    %160 = vector.broadcast %cst_57 : f32 to vector<24x1xf32>
    %161 = arith.divf %159, %160 : vector<24x1xf32>
    %162 = vector.broadcast %161 : vector<24x1xf32> to vector<24x128xf32>
    %163 = arith.subf %153, %162 : vector<24x128xf32>
    %164 = arith.mulf %163, %163 : vector<24x128xf32>
    %cst_58 = arith.constant dense<0.000000e+00> : vector<24xf32>
    %165 = vector.multi_reduction <add>, %164, %cst_58 [1] : vector<24x128xf32> to vector<24xf32>
    %166 = vector.shape_cast %165 : vector<24xf32> to vector<24x1xf32>
    %cst_59 = arith.constant 1.280000e+02 : f32
    %167 = vector.broadcast %cst_59 : f32 to vector<24x1xf32>
    %168 = arith.divf %166, %167 : vector<24x1xf32>
    %169 = vector.broadcast %161 : vector<24x1xf32> to vector<24x128xf32>
    %170 = arith.subf %153, %169 : vector<24x128xf32>
    %cst_60 = arith.constant 9.99999996E-13 : f32
    %171 = vector.broadcast %cst_60 : f32 to vector<24x1xf32>
    %172 = arith.addf %168, %171 : vector<24x1xf32>
    %173 = math.rsqrt %172 : vector<24x1xf32>
    %174 = vector.broadcast %173 : vector<24x1xf32> to vector<24x128xf32>
    %175 = arith.mulf %170, %174 : vector<24x128xf32>
    %176 = vector.broadcast %155 : vector<1x128xf32> to vector<24x128xf32>
    %177 = arith.mulf %175, %176 : vector<24x128xf32>
    %178 = vector.broadcast %157 : vector<1x128xf32> to vector<24x128xf32>
    %179 = arith.addf %177, %178 : vector<24x128xf32>
    %c0_61 = arith.constant 0 : index
    %c0_62 = arith.constant 0 : index
    %c0_63 = arith.constant 0 : index
    %180 = vector.load %arg11[%c0_61, %c0_62, %c0_63] : memref<1x128x256xbf16, #tpu.memory_space<vmem>>, vector<1x128x256xbf16>
    %181 = vector.shape_cast %180 : vector<1x128x256xbf16> to vector<128x256xbf16>
    %c0_64 = arith.constant 0 : index
    %c0_65 = arith.constant 0 : index
    %c0_66 = arith.constant 0 : index
    %182 = vector.load %arg12[%c0_64, %c0_65, %c0_66] : memref<1x1x256xf32, #tpu.memory_space<vmem>>, vector<1x1x256xf32>
    %183 = vector.shape_cast %182 : vector<1x1x256xf32> to vector<1x256xf32>
    %184 = arith.truncf %179 : vector<24x128xf32> to vector<24x128xbf16>
    %cst_67 = arith.constant dense<0.000000e+00> : vector<24x256xf32>
    %185 = tpu.matmul %184, %181, %cst_67 {dimension_numbers = #tpu.dot_dimension_numbers<[1], [0], [0], [1], [0, 0, 1, 1], [], []>} : vector<24x128xbf16>, vector<128x256xbf16>, vector<24x256xf32> -> vector<24x256xf32>
    %186 = vector.broadcast %183 : vector<1x256xf32> to vector<24x256xf32>
    %187 = arith.addf %185, %186 : vector<24x256xf32>
    %188 = arith.mulf %187, %187 : vector<24x256xf32>
    %189 = arith.mulf %187, %188 : vector<24x256xf32>
    %cst_68 = arith.constant 4.471500e-02 : f32
    %190 = vector.broadcast %cst_68 : f32 to vector<24x256xf32>
    %191 = arith.mulf %190, %189 : vector<24x256xf32>
    %192 = arith.addf %187, %191 : vector<24x256xf32>
    %cst_69 = arith.constant 0.797884583 : f32
    %193 = vector.broadcast %cst_69 : f32 to vector<24x256xf32>
    %194 = arith.mulf %193, %192 : vector<24x256xf32>
    %195 = math.tanh %194 : vector<24x256xf32>
    %cst_70 = arith.constant 1.000000e+00 : f32
    %196 = vector.broadcast %cst_70 : f32 to vector<24x256xf32>
    %197 = arith.addf %196, %195 : vector<24x256xf32>
    %cst_71 = arith.constant 5.000000e-01 : f32
    %198 = vector.broadcast %cst_71 : f32 to vector<24x256xf32>
    %199 = arith.mulf %198, %197 : vector<24x256xf32>
    %200 = arith.mulf %187, %199 : vector<24x256xf32>
    %c0_72 = arith.constant 0 : index
    %c0_73 = arith.constant 0 : index
    %c0_74 = arith.constant 0 : index
    %201 = vector.load %arg13[%c0_72, %c0_73, %c0_74] : memref<1x256x128xbf16, #tpu.memory_space<vmem>>, vector<1x256x128xbf16>
    %202 = vector.shape_cast %201 : vector<1x256x128xbf16> to vector<256x128xbf16>
    %c0_75 = arith.constant 0 : index
    %c0_76 = arith.constant 0 : index
    %c0_77 = arith.constant 0 : index
    %203 = vector.load %arg14[%c0_75, %c0_76, %c0_77] : memref<1x1x128xf32, #tpu.memory_space<vmem>>, vector<1x1x128xf32>
    %204 = vector.shape_cast %203 : vector<1x1x128xf32> to vector<1x128xf32>
    %205 = arith.truncf %200 : vector<24x256xf32> to vector<24x256xbf16>
    %cst_78 = arith.constant dense<0.000000e+00> : vector<24x128xf32>
    %206 = tpu.matmul %205, %202, %cst_78 {dimension_numbers = #tpu.dot_dimension_numbers<[1], [0], [0], [1], [0, 0, 1, 1], [], []>} : vector<24x256xbf16>, vector<256x128xbf16>, vector<24x128xf32> -> vector<24x128xf32>
    %207 = vector.broadcast %204 : vector<1x128xf32> to vector<24x128xf32>
    %208 = arith.addf %206, %207 : vector<24x128xf32>
    %209 = arith.addf %153, %208 : vector<24x128xf32>
    %210 = vector.shape_cast %209 : vector<24x128xf32> to vector<1x24x128xf32>
    %c0_79 = arith.constant 0 : index
    %c0_80 = arith.constant 0 : index
    %c0_81 = arith.constant 0 : index
    %211 = vector.load %arg15[%c0_79, %c0_80, %c0_81] : memref<1x24x128xf32, #tpu.memory_space<vmem>>, vector<1x24x128xf32>
    tpu.vector_store %arg15[%c0_79, %c0_80, %c0_81], %210 {strides = array<i32>} : memref<1x24x128xf32, #tpu.memory_space<vmem>>, vector<1x24x128xf32>,
    return
  }
  func.func @transform_0(%arg0: i32, %arg1: i32) -> (i32, i32, i32) {
    %c0_i32 = arith.constant 0 : i32
    %c0_i32_0 = arith.constant 0 : i32
    %c0_i32_1 = arith.constant 0 : i32
    return %arg0, %c0_i32, %c0_i32_0 : i32, i32, i32
  }
  func.func @transform_1(%arg0: i32, %arg1: i32) -> (i32, i32, i32) {
    %c0_i32 = arith.constant 0 : i32
    %c0_i32_0 = arith.constant 0 : i32
    %c0_i32_1 = arith.constant 0 : i32
    return %arg1, %c0_i32, %c0_i32_0 : i32, i32, i32
  }
  func.func @transform_2(%arg0: i32, %arg1: i32) -> (i32, i32, i32) {
    %c0_i32 = arith.constant 0 : i32
    %c0_i32_0 = arith.constant 0 : i32
    %c0_i32_1 = arith.constant 0 : i32
    return %arg1, %c0_i32, %c0_i32_0 : i32, i32, i32
  }
  func.func @transform_3(%arg0: i32, %arg1: i32) -> (i32, i32, i32) {
    %c0_i32 = arith.constant 0 : i32
    %c0_i32_0 = arith.constant 0 : i32
    %c0_i32_1 = arith.constant 0 : i32
    return %arg1, %c0_i32, %c0_i32_0 : i32, i32, i32
  }
  func.func @transform_4(%arg0: i32, %arg1: i32) -> (i32, i32, i32) {
    %c0_i32 = arith.constant 0 : i32
    %c0_i32_0 = arith.constant 0 : i32
    %c0_i32_1 = arith.constant 0 : i32
    return %arg1, %c0_i32, %c0_i32_0 : i32, i32, i32
  }
  func.func @transform_5(%arg0: i32, %arg1: i32) -> (i32, i32, i32) {
    %c0_i32 = arith.constant 0 : i32
    %c0_i32_0 = arith.constant 0 : i32
    %c0_i32_1 = arith.constant 0 : i32
    return %arg1, %c0_i32, %c0_i32_0 : i32, i32, i32
  }
  func.func @transform_6(%arg0: i32, %arg1: i32) -> (i32, i32, i32) {
    %c0_i32 = arith.constant 0 : i32
    %c0_i32_0 = arith.constant 0 : i32
    %c0_i32_1 = arith.constant 0 : i32
    return %arg1, %c0_i32, %c0_i32_0 : i32, i32, i32
  }
  func.func @transform_7(%arg0: i32, %arg1: i32) -> (i32, i32, i32) {
    %c0_i32 = arith.constant 0 : i32
    %c0_i32_0 = arith.constant 0 : i32
    %c0_i32_1 = arith.constant 0 : i32
    return %arg1, %c0_i32, %c0_i32_0 : i32, i32, i32
  }
  func.func @transform_8(%arg0: i32, %arg1: i32) -> (i32, i32, i32) {
    %c0_i32 = arith.constant 0 : i32
    %c0_i32_0 = arith.constant 0 : i32
    %c0_i32_1 = arith.constant 0 : i32
    return %arg1, %c0_i32, %c0_i32_0 : i32, i32, i32
  }
  func.func @transform_9(%arg0: i32, %arg1: i32) -> (i32, i32, i32) {
    %c0_i32 = arith.constant 0 : i32
    %c0_i32_0 = arith.constant 0 : i32
    %c0_i32_1 = arith.constant 0 : i32
    return %arg1, %c0_i32, %c0_i32_0 : i32, i32, i32
  }
  func.func @transform_10(%arg0: i32, %arg1: i32) -> (i32, i32, i32) {
    %c0_i32 = arith.constant 0 : i32
    %c0_i32_0 = arith.constant 0 : i32
    %c0_i32_1 = arith.constant 0 : i32
    return %arg1, %c0_i32, %c0_i32_0 : i32, i32, i32
  }
  func.func @transform_11(%arg0: i32, %arg1: i32) -> (i32, i32, i32) {
    %c0_i32 = arith.constant 0 : i32
    %c0_i32_0 = arith.constant 0 : i32
    %c0_i32_1 = arith.constant 0 : i32
    return %arg1, %c0_i32, %c0_i32_0 : i32, i32, i32
  }
  func.func @transform_12(%arg0: i32, %arg1: i32) -> (i32, i32, i32) {
    %c0_i32 = arith.constant 0 : i32
    %c0_i32_0 = arith.constant 0 : i32
    %c0_i32_1 = arith.constant 0 : i32
    return %arg1, %c0_i32, %c0_i32_0 : i32, i32, i32
  }
  func.func @transform_13(%arg0: i32, %arg1: i32) -> (i32, i32, i32) {
    %c0_i32 = arith.constant 0 : i32
    %c0_i32_0 = arith.constant 0 : i32
    %c0_i32_1 = arith.constant 0 : i32
    return %arg0, %c0_i32, %c0_i32_0 : i32, i32, i32
  }
}

module attributes {stable_mosaic.version = 11 : i64} {
  func.func @_pool_heads_kernel(%arg0: memref<2x128xf32, #tpu.memory_space<vmem>>, %arg1: memref<1x128xf32, #tpu.memory_space<vmem>>, %arg2: memref<1x128xf32, #tpu.memory_space<vmem>>, %arg3: memref<128x128xbf16, #tpu.memory_space<vmem>>, %arg4: memref<1x128xf32, #tpu.memory_space<vmem>>, %arg5: memref<128x128xbf16, #tpu.memory_space<vmem>>, %arg6: memref<1x128xf32, #tpu.memory_space<vmem>>, %arg7: memref<2x128xf32, #tpu.memory_space<vmem>>) attributes {dimension_semantics = [], scalar_prefetch = 0 : i64, scratch_operands = 0 : i64, tpu.core_type = #tpu.core_type<tc>} {
    %c0 = arith.constant 0 : index
    %c0_0 = arith.constant 0 : index
    %0 = vector.load %arg0[%c0, %c0_0] : memref<2x128xf32, #tpu.memory_space<vmem>>, vector<2x128xf32>
    %cst = arith.constant dense<0.000000e+00> : vector<2xf32>
    %1 = vector.multi_reduction <add>, %0, %cst [1] : vector<2x128xf32> to vector<2xf32>
    %2 = vector.shape_cast %1 : vector<2xf32> to vector<2x1xf32>
    %cst_1 = arith.constant 1.280000e+02 : f32
    %3 = vector.broadcast %cst_1 : f32 to vector<2x1xf32>
    %4 = arith.divf %2, %3 : vector<2x1xf32>
    %5 = vector.broadcast %4 : vector<2x1xf32> to vector<2x128xf32>
    %6 = arith.subf %0, %5 : vector<2x128xf32>
    %7 = arith.mulf %6, %6 : vector<2x128xf32>
    %cst_2 = arith.constant dense<0.000000e+00> : vector<2xf32>
    %8 = vector.multi_reduction <add>, %7, %cst_2 [1] : vector<2x128xf32> to vector<2xf32>
    %9 = vector.shape_cast %8 : vector<2xf32> to vector<2x1xf32>
    %cst_3 = arith.constant 1.280000e+02 : f32
    %10 = vector.broadcast %cst_3 : f32 to vector<2x1xf32>
    %11 = arith.divf %9, %10 : vector<2x1xf32>
    %12 = vector.broadcast %4 : vector<2x1xf32> to vector<2x128xf32>
    %13 = arith.subf %0, %12 : vector<2x128xf32>
    %cst_4 = arith.constant 9.99999996E-13 : f32
    %14 = vector.broadcast %cst_4 : f32 to vector<2x1xf32>
    %15 = arith.addf %11, %14 : vector<2x1xf32>
    %16 = math.rsqrt %15 : vector<2x1xf32>
    %17 = vector.broadcast %16 : vector<2x1xf32> to vector<2x128xf32>
    %18 = arith.mulf %13, %17 : vector<2x128xf32>
    %c0_5 = arith.constant 0 : index
    %c0_6 = arith.constant 0 : index
    %19 = vector.load %arg1[%c0_5, %c0_6] : memref<1x128xf32, #tpu.memory_space<vmem>>, vector<1x128xf32>
    %20 = vector.broadcast %19 : vector<1x128xf32> to vector<2x128xf32>
    %21 = arith.mulf %18, %20 : vector<2x128xf32>
    %c0_7 = arith.constant 0 : index
    %c0_8 = arith.constant 0 : index
    %22 = vector.load %arg2[%c0_7, %c0_8] : memref<1x128xf32, #tpu.memory_space<vmem>>, vector<1x128xf32>
    %23 = vector.broadcast %22 : vector<1x128xf32> to vector<2x128xf32>
    %24 = arith.addf %21, %23 : vector<2x128xf32>
    %25 = arith.truncf %24 : vector<2x128xf32> to vector<2x128xbf16>
    %c0_9 = arith.constant 0 : index
    %c0_10 = arith.constant 0 : index
    %26 = vector.load %arg3[%c0_9, %c0_10] : memref<128x128xbf16, #tpu.memory_space<vmem>>, vector<128x128xbf16>
    %cst_11 = arith.constant dense<0.000000e+00> : vector<2x128xf32>
    %27 = tpu.matmul %25, %26, %cst_11 {dimension_numbers = #tpu.dot_dimension_numbers<[1], [0], [0], [1], [0, 0, 1, 1], [], []>} : vector<2x128xbf16>, vector<128x128xbf16>, vector<2x128xf32> -> vector<2x128xf32>
    %c0_12 = arith.constant 0 : index
    %c0_13 = arith.constant 0 : index
    %28 = vector.load %arg4[%c0_12, %c0_13] : memref<1x128xf32, #tpu.memory_space<vmem>>, vector<1x128xf32>
    %29 = vector.broadcast %28 : vector<1x128xf32> to vector<2x128xf32>
    %30 = arith.addf %27, %29 : vector<2x128xf32>
    %31 = math.tanh %30 : vector<2x128xf32>
    %32 = arith.truncf %31 : vector<2x128xf32> to vector<2x128xbf16>
    %c0_14 = arith.constant 0 : index
    %c0_15 = arith.constant 0 : index
    %33 = vector.load %arg5[%c0_14, %c0_15] : memref<128x128xbf16, #tpu.memory_space<vmem>>, vector<128x128xbf16>
    %cst_16 = arith.constant dense<0.000000e+00> : vector<2x128xf32>
    %34 = tpu.matmul %32, %33, %cst_16 {dimension_numbers = #tpu.dot_dimension_numbers<[1], [0], [0], [1], [0, 0, 1, 1], [], []>} : vector<2x128xbf16>, vector<128x128xbf16>, vector<2x128xf32> -> vector<2x128xf32>
    %c0_17 = arith.constant 0 : index
    %c0_18 = arith.constant 0 : index
    %35 = vector.load %arg6[%c0_17, %c0_18] : memref<1x128xf32, #tpu.memory_space<vmem>>, vector<1x128xf32>
    %36 = vector.broadcast %35 : vector<1x128xf32> to vector<2x128xf32>
    %37 = arith.addf %34, %36 : vector<2x128xf32>
    %c0_19 = arith.constant 0 : index
    %c0_20 = arith.constant 0 : index
    %38 = vector.load %arg7[%c0_19, %c0_20] : memref<2x128xf32, #tpu.memory_space<vmem>>, vector<2x128xf32>
    tpu.vector_store %arg7[%c0_19, %c0_20], %37 {strides = array<i32>} : memref<2x128xf32, #tpu.memory_space<vmem>>, vector<2x128xf32>,
    return
  }
}

</mosaic_0001>

<bundles_post_ra>
// kernel: digits_vit_forward.3
= control target key start
LH: loop header
LB: loop body
LE: loop exit
PB: predicated region body
PF: predicated region fallthrough
CT: control target
= control target key end

     0   :  { %s601_s18 = smov 0   ;;  %s705_s0 = inlined_call_operand.vmem [shape: f32[2,24,192], index: 0, kind: input, shape index: {}]   ;;  %s706_s1 = inlined_call_operand.vmem [shape: bf16[192,128], index: 1, kind: input, shape index: {}]   ;;  %s707_s2 = inlined_call_operand.vmem [shape: f32[1,128], index: 2, kind: input, shape index: {}]   ;;  %s708_s3 = inlined_call_operand.vmem [shape: f32[1,128], index: 3, kind: input, shape index: {}]   ;;  %s709_s4 = inlined_call_operand.vmem [shape: f32[24,128], index: 4, kind: input, shape index: {}]   ;;  %s710_s5 = inlined_call_operand.vmem [shape: f32[2,24,128], index: 5, kind: output, shape index: {}]  }
   0x1 LB: > { %s490_s19 = sadd.s32 4294967295, %s568_s18   ;;  %p494_p0 = scmp.ge.s32.totalorder %s568_s18, 1  ;;  %s568_s18 = sphi %s601_s18, %s15_s18  }
   0x2   : > { %p187_p1 = scmp.lt.s32.totalorder %s568_s18, 3 }
   0x4   : > { %p188_p2 = pnand %p494_p0, %p187_p1 }
   0x5   : > { %v550_v0 = vld [vmem:[%s706_s1] sm:$0xff] (!%p188_p2)   ;;  %v570_v1 = vmov (!%p188_p2), 0   ;;  %p215_p3 = scmp.lt.s32.totalorder (!%p188_p2), %s490_s19, 1  ;;  %v551_v2 = vld [vmem:[%s706_s1 + $0x8] sm:$0xff] (!%p188_p2)   ;;  %v552_v3 = vld [vmem:[%s706_s1 + $0x10] sm:$0xff] (!%p188_p2)   ;;  %vm352_vm0 = vcmask (!%p188_p2), 523264   ;;  %v260_v23 = vlaneseq (!%p188_p2) }
   0x6   : > { %191 = sbr.rel (%p188_p2) target bundleno = 274 (0x112), region = 40  ;;  %359 = vmatprep.subr.bf16.mxu0 (!%p188_p2), %v570_v1  ;;  %515 = vmatprep.subr.bf16.mxu1 (!%p188_p2), %v570_v1  ;;  %v553_v4 = vld [vmem:[%s706_s1 + $0x18] sm:$0xff] (!%p188_p2)   ;;  %v554_v10 = vld [vmem:[%s706_s1 + $0x20] sm:$0xff] (!%p188_p2)   ;;  %v555_v11 = vld [vmem:[%s706_s1 + $0x28] sm:$0xff] (!%p188_p2)  }
   0x7   : > { %360 = vmatpush1.bf16.msra.mxu0 (!%p188_p2), %v550_v0  ;;  %527 = vmatpush1.bf16.msra.mxu1 (!%p188_p2), %v550_v0  ;;  %v556_v12 = vld [vmem:[%s706_s1 + $0x30] sm:$0xff] (!%p188_p2)   ;;  %v557_v13 = vld [vmem:[%s706_s1 + $0x38] sm:$0xff] (!%p188_p2)   ;;  %v558_v14 = vld [vmem:[%s706_s1 + $0x40] sm:$0xff] (!%p188_p2)   ;;  %v261_v24 = vshrl.u32 (!%p188_p2), %v260_v23, 7 }
   0x8   : > { %361 = vmatprep.subr.bf16.mxu0 (!%p188_p2), %v570_v1  ;;  %516 = vmatprep.subr.bf16.mxu1 (!%p188_p2), %v570_v1  ;;  %v559_v15 = vld [vmem:[%s706_s1 + $0x48] sm:$0xff] (!%p188_p2)   ;;  %v560_v16 = vld [vmem:[%s706_s1 + $0x50] sm:$0xff] (!%p188_p2)   ;;  %v561_v17 = vld [vmem:[%s706_s1 + $0x58] sm:$0xff] (!%p188_p2)  }
   0x9   : > { %v263_v25 = vadd.s32 (!%p188_p2), 16, %v261_v24  ;;  %v497_v26 = vld [vmem:[%s707_s2] ss:$0 sm:$0xff] (!%p188_p2)  ;;  %vm410_vm1 = vcmp.eq.s32.totalorder (!%p188_p2), %v261_v24, 0  ;;  %vm264_vm2 = vcmp.ge.s32.totalorder (!%p188_p2), %v261_v24, 1  ;;  %v428_v33 = vld [vmem:[%s709_s4 + $0x10] sm:$0xff] (!%p188_p2) }
   0xa   : > { %v512_v27 = vld [vmem:[%s708_s3] ss:$0 sm:$0xff] (!%p188_p2)  ;;  %v427_v37 = vld [vmem:[%s709_s4 + $0x8] sm:$0xff] (!%p188_p2) }
   0xb   : > { %362 = vmatpush1.bf16.msra.mxu0 (!%p188_p2), %v551_v2  ;;  %528 = vmatpush1.bf16.msra.mxu1 (!%p188_p2), %v551_v2  ;;  %vm269_vm3 = vcmp.le.s32.totalorder (!%p188_p2), %v263_v25, 16  ;;  %v420_v31 = vsel (!%p188_p2), %vm410_vm1, %v512_v27, 0.0  ;;  %v426_v40 = vld [vmem:[%s709_s4] sm:$0xff] (!%p188_p2) }
   0xc   : > { %363 = vmatprep.subr.bf16.mxu0 (!%p188_p2), %v570_v1  ;;  %517 = vmatprep.subr.bf16.mxu1 (!%p188_p2), %v570_v1 }
   0xd   : > { %s712_s19 = smov (!%p215_p3, %s490_s19), 1 }
   0xe   : > { %s539_s24 = smul.u32 48, %s712_s19 }
   0xf   : > { %364 = vmatpush1.bf16.msra.mxu0 %v552_v3  ;;  %529 = vmatpush1.bf16.msra.mxu1 %v552_v3 }
  0x10   : > { %s630_s29 = scalar_lea.vmem %s705_s0, %s539_s24  ;;  %365 = vmatprep.subr.bf16.mxu0 %v570_v1  ;;  %518 = vmatprep.subr.bf16.mxu1 %v570_v1 }
  0x11   : > { %v227_v5 = vld [vmem:[%s630_s29 + $0x8] sm:$0xff]  ;;  %v229_v6 = vld [vmem:[%s630_s29 + $0x18] sm:$0xff]  ;;  %v226_v18 = vld [vmem:[%s630_s29] sm:$0xff] }
  0x12   : > { %v231_v7 = vld [vmem:[%s630_s29 + $0x28] sm:$0xff]  ;;  %v233_v8 = vpack.c.bf16 %v229_v6, %v227_v5  ;;  %v228_v19 = vld [vmem:[%s630_s29 + $0x10] sm:$0xff]  ;;  %v230_v20 = vld [vmem:[%s630_s29 + $0x20] sm:$0xff]  ;;  %s540_s29 = smul.u32 24, %s712_s19 }
  0x13   : > { %v235_v9 = vpack.c.bf16 %v231_v7, %v231_v7  ;;  %366 = vmatpush1.bf16.msra.mxu0 %v553_v4  ;;  %530 = vmatpush1.bf16.msra.mxu1 %v553_v4  ;;  %v232_v21 = vpack.c.bf16 %v228_v19, %v226_v18  ;;  %v234_v22 = vpack.c.bf16 %v230_v20, %v230_v20 }
  0x14   : > { %367 = vmatprep.subr.bf16.mxu0 %v570_v1  ;;  %519 = vmatprep.subr.bf16.mxu1 %v570_v1  ;;  %s224_s12 = scalar_lea.vmem %s710_s5, %s540_s29 }
  0x15   : > { %510 = vmatprep.mubr.msk.bf16.mxu0 %vm352_vm0, %v233_v8  ;;  %511 = vmatprep.mubr.msk.bf16.mxu1 %vm352_vm0, %v235_v9 }
  0x17   : > { %368 = vmatpush1.bf16.msra.mxu0 %v554_v10  ;;  %531 = vmatpush1.bf16.msra.mxu1 %v554_v10 }
  0x18   : > { %369 = vmatprep.subr.bf16.mxu0 %v570_v1  ;;  %520 = vmatprep.subr.bf16.mxu1 %v570_v1 }
  0x1b   : > { %370 = vmatpush1.bf16.msra.mxu0 %v555_v11  ;;  %532 = vmatpush1.bf16.msra.mxu1 %v555_v11 }
  0x1c   : > { %371 = vmatprep.subr.bf16.mxu0 %v570_v1  ;;  %521 = vmatprep.subr.bf16.mxu1 %v570_v1 }
  0x1f   : > { %372 = vmatpush1.bf16.msra.mxu0 %v556_v12  ;;  %533 = vmatpush1.bf16.msra.mxu1 %v556_v12 }
  0x20   : > { %373 = vmatprep.subr.bf16.mxu0 %v570_v1  ;;  %522 = vmatprep.subr.bf16.mxu1 %v570_v1 }
  0x23   : > { %374 = vmatpush1.bf16.msra.mxu0 %v557_v13  ;;  %534 = vmatpush1.bf16.msra.mxu1 %v557_v13 }
  0x24   : > { %375 = vmatprep.subr.bf16.mxu0 %v570_v1  ;;  %523 = vmatprep.subr.bf16.mxu1 %v570_v1 }
  0x27   : > { %376 = vmatpush1.bf16.msra.mxu0 %v558_v14  ;;  %535 = vmatpush1.bf16.msra.mxu1 %v558_v14 }
  0x28   : > { %377 = vmatprep.subr.bf16.mxu0 %v570_v1  ;;  %524 = vmatprep.subr.bf16.mxu1 %v570_v1 }
  0x2b   : > { %378 = vmatpush1.bf16.msra.mxu0 %v559_v15  ;;  %536 = vmatpush1.bf16.msra.mxu1 %v559_v15 }
  0x2c   : > { %379 = vmatprep.subr.bf16.mxu0 %v570_v1  ;;  %525 = vmatprep.subr.bf16.mxu1 %v570_v1 }
  0x2f   : > { %380 = vmatpush1.bf16.msra.mxu0 %v560_v16  ;;  %537 = vmatpush1.bf16.msra.mxu1 %v560_v16 }
  0x30   : > { %381 = vmatprep.subr.bf16.mxu0 %v570_v1  ;;  %526 = vmatprep.subr.bf16.mxu1 %v570_v1 }
  0x33   : > { %382 = vmatpush1.bf16.msra.mxu0 %v561_v17  ;;  %538 = vmatpush1.bf16.msra.mxu1 %v561_v17 }
  0x36   : > { %392 = vmatmul.mubr.bf16.vlgmr.msra.gmra.mrb[0].mxu0 %v232_v21  ;;  %400 = vmatmul.mubr.bf16.vlgmr.msra.gmra.mrb[0].mxu1 %v234_v22 }
 0x109   : > { %v393_v28 = vpop.f32.mrb[0].mxu0  ;;  %v401_v29 = vpop.f32.mrb[0].mxu1 }
 0x10a   : > { %v394_v30 = vadd.f32 %v497_v26, %v393_v28  ;;  %v402_v32 = vadd.f32 %v497_v26, %v401_v29  ;;  %v395_v34 = vpop.f32.mrb[1].mxu0  ;;  %v403_v35 = vpop.f32.mrb[1].mxu1 }
 0x10b   : > { %v396_v36 = vpop.f32.mrb[2].mxu0  ;;  %v404_v38 = vpop.f32.mrb[2].mxu1 }
 0x10c   : > { %v407_v39 = vsel %vm264_vm2, %v394_v30, 0.0  ;;  %v409_v41 = vsel %vm269_vm3, %v402_v32, 0.0  ;;  %v397_v42 = vadd.f32 %v497_v26, %v396_v36  ;;  %v398_v43 = vpop.f32.mrb[3].mxu0  ;;  %v405_v44 = vpop.f32.mrb[3].mxu1 }
 0x10d   : > { %v423_v45 = vadd.f32 %v420_v31, %v407_v39  ;;  %v431_v46 = vadd.f32 %v428_v33, %v409_v41 }
 0x10e   : > { %v430_v47 = vadd.f32 %v427_v37, %v397_v42 }
 0x10f   : > { %v429_v48 = vadd.f32 %v426_v40, %v423_v45  ;;  %434 = vst [vmem:[%s224_s12 + $0x10] sm:$0xff] %v431_v46 }
 0x110   : > { %433 = vst [vmem:[%s224_s12 + $0x8] sm:$0xff] %v430_v47 }
 0x111   : > { %432 = vst [vmem:[%s224_s12] sm:$0xff] %v429_v48 }
 0x112 PF: > { %s15_s18 = sadd.s32 1, %s568_s18  }
 0x113   : > { %p12_p4 = scmp.ge.s32.totalorder %s15_s18, 4  }
 0x115   :  { %14 = sbr.rel (!%p12_p4) target bundleno = 1 (0x1), region = 70 }

// kernel: digits_vit_forward.5
= control target key start
LH: loop header
LB: loop body
LE: loop exit
PB: predicated region body
PF: predicated region fallthrough
CT: control target
= control target key end

     0   :  { %vm28_vm0 = vcmask 1041408   ;;  %v389_v2 = vmov 0.0   ;;  %vm390_vm1 = vmmov 0   ;;  %s517_s0 = inlined_call_operand.vmem [shape: f32[2,128], index: 0, kind: input, shape index: {}]   ;;  %s518_s3 = inlined_call_operand.vmem [shape: bf16[128,128], index: 3, kind: input, shape index: {}]   ;;  %s519_s5 = inlined_call_operand.vmem [shape: bf16[128,128], index: 5, kind: input, shape index: {}]   ;;  %s520_s1 = inlined_call_operand.vmem [shape: f32[1,128], index: 1, kind: input, shape index: {}]   ;;  %s521_s2 = inlined_call_operand.vmem [shape: f32[1,128], index: 2, kind: input, shape index: {}]   ;;  %s522_s4 = inlined_call_operand.vmem [shape: f32[1,128], index: 4, kind: input, shape index: {}]   ;;  %s523_s6 = inlined_call_operand.vmem [shape: f32[1,128], index: 6, kind: input, shape index: {}]   ;;  %s524_s7 = inlined_call_operand.vmem [shape: f32[2,128], index: 7, kind: output, shape index: {}]  }
   0x1   :  { %v27_v0 = vld [vmem:[%s517_s0] sm:$0x3]  ;;  %327 = vmatprep.subr.bf16.mxu0 %v389_v2  ;;  %347 = vmatprep.subr.bf16.mxu1 %v389_v2  ;;  %v370_v4 = vld [vmem:[%s518_s3 + $0x8] sm:$0xff]   ;;  %v371_v10 = vld [vmem:[%s518_s3 + $0x10] sm:$0xff]  }
   0x2   :  { %v29_v1 = vsel %vm28_vm0, %v27_v0, 0.0  ;;  %v369_v3 = vld [vmem:[%s518_s3] sm:$0xff]   ;;  %v372_v11 = vld [vmem:[%s518_s3 + $0x18] sm:$0xff]   ;;  %343 = vmatprep.mubr.msk.bf16.mxu0 %vm390_vm1, %v389_v2  ;;  %363 = vmatprep.mubr.msk.bf16.mxu1 %vm390_vm1, %v389_v2  ;;  %v374_v13 = vld [vmem:[%s518_s3 + $0x28] sm:$0xff]  }
   0x3   :  { %30 = vadd.xlane.f32.xlu0 %v29_v1  ;;  %328 = vmatpush3.bf16.msra.mxu0 %v369_v3  ;;  %v373_v12 = vld [vmem:[%s518_s3 + $0x20] sm:$0xff]   ;;  %v375_v14 = vld [vmem:[%s518_s3 + $0x30] sm:$0xff]   ;;  %v376_v15 = vld [vmem:[%s518_s3 + $0x38] sm:$0xff]  }
   0x4   :  { %329 = vmatprep.subr.bf16.mxu0 %v389_v2  ;;  %v377_v16 = vld [vmem:[%s519_s5] sm:$0xff]   ;;  %v378_v17 = vld [vmem:[%s519_s5 + $0x8] sm:$0xff]   ;;  %v379_v18 = vld [vmem:[%s519_s5 + $0x10] sm:$0xff]  }
   0x5   :  { %348 = vmatpush3.bf16.msra.mxu1 %v377_v16  ;;  %v380_v19 = vld [vmem:[%s519_s5 + $0x18] sm:$0xff]   ;;  %v289_v24 = vld [vmem:[%s520_s1] ss:$0 sm:$0xff]  ;;  %v382_v31 = vld [vmem:[%s519_s5 + $0x28] sm:$0xff]  }
   0x6   :  { %349 = vmatprep.subr.bf16.mxu1 %v389_v2  ;;  %v290_v26 = vld [vmem:[%s521_s2] ss:$0 sm:$0xff]  ;;  %v383_v32 = vld [vmem:[%s519_s5 + $0x30] sm:$0xff]   ;;  %v384_v33 = vld [vmem:[%s519_s5 + $0x38] sm:$0xff]  }
   0x7   :  { %330 = vmatpush3.bf16.msra.mxu0 %v370_v4  ;;  %v381_v30 = vld [vmem:[%s519_s5 + $0x20] sm:$0xff]  }
   0x8   :  { %331 = vmatprep.subr.bf16.mxu0 %v389_v2  ;;  %v291_v34 = vld [vmem:[%s522_s4] ss:$0 sm:$0xff] }
   0x9   :  { %350 = vmatpush3.bf16.msra.mxu1 %v378_v17  ;;  %v300_v42 = vld [vmem:[%s523_s6] ss:$0 sm:$0xff] }
   0xa   :  { %351 = vmatprep.subr.bf16.mxu1 %v389_v2 }
   0xb   :  { %332 = vmatpush3.bf16.msra.mxu0 %v371_v10 }
   0xc   :  { %333 = vmatprep.subr.bf16.mxu0 %v389_v2 }
   0xd   :  { %352 = vmatpush3.bf16.msra.mxu1 %v379_v18 }
   0xe   :  { %353 = vmatprep.subr.bf16.mxu1 %v389_v2 }
   0xf   :  { %334 = vmatpush3.bf16.msra.mxu0 %v372_v11 }
  0x10   :  { %335 = vmatprep.subr.bf16.mxu0 %v389_v2 }
  0x11   :  { %354 = vmatpush3.bf16.msra.mxu1 %v380_v19 }
  0x12   :  { %355 = vmatprep.subr.bf16.mxu1 %v389_v2 }
  0x13   :  { %336 = vmatpush3.bf16.msra.mxu0 %v373_v12 }
  0x14   :  { %337 = vmatprep.subr.bf16.mxu0 %v389_v2 }
  0x15   :  { %356 = vmatpush3.bf16.msra.mxu1 %v381_v30 }
  0x16   :  { %357 = vmatprep.subr.bf16.mxu1 %v389_v2 }
  0x17   :  { %338 = vmatpush3.bf16.msra.mxu0 %v374_v13 }
  0x18   :  { %339 = vmatprep.subr.bf16.mxu0 %v389_v2 }
  0x19   :  { %358 = vmatpush3.bf16.msra.mxu1 %v382_v31 }
  0x1a   :  { %359 = vmatprep.subr.bf16.mxu1 %v389_v2 }
  0x1b   :  { %340 = vmatpush3.bf16.msra.mxu0 %v375_v14 }
  0x1c   :  { %341 = vmatprep.subr.bf16.mxu0 %v389_v2 }
  0x1d   :  { %360 = vmatpush3.bf16.msra.mxu1 %v383_v32 }
  0x1e   :  { %361 = vmatprep.subr.bf16.mxu1 %v389_v2 }
  0x1f   :  { %342 = vmatpush3.bf16.msra.mxu0 %v376_v15 }
  0x21   :  { %362 = vmatpush3.bf16.msra.mxu1 %v384_v33 }
  0x90   :  { %v31_v5 = vpop.xlane.xlu0 %30 }
  0x91   :  { %v33_v6 = vmul.f32 0.0078125, %v31_v5 }
  0x93   :  { %v34_v7 = vsub.f32 %v27_v0, %v33_v6 }
  0x95   :  { %v35_v8 = vmul.f32 %v34_v7, %v34_v7 }
  0x97   :  { %v36_v9 = vsel %vm28_vm0, %v35_v8, 0.0 }
  0x98   :  { %37 = vadd.xlane.f32.xlu0 %v36_v9 }
 0x125   :  { %v38_v20 = vpop.xlane.xlu0 %37 }
 0x126   :  { %v39_v21 = vmul.f32 0.0078125, %v38_v20 }
 0x128   :  { %v40_v22 = vadd.f32 1e-12, %v39_v21 }
 0x12a   :  { %385 = vrsqrt.f32 %v40_v22 }
 0x134   :  { %v386_v23 = vpop.eup %385 }
 0x135   :  { %v42_v25 = vmul.f32 %v386_v23, %v34_v7 }
 0x137   :  { %v50_v27 = vmul.f32 %v289_v24, %v42_v25 }
 0x139   :  { %v58_v28 = vadd.f32 %v290_v26, %v50_v27 }
 0x13b   :  { %v59_v29 = vpack.c.bf16 %v58_v28, %v58_v28 }
 0x13d   :  { %344 = vmatmul.mubr.bf16.vlgmr.msra.gmra.mrb[0].mxu0 %v59_v29 }
 0x210   :  { %v165_v35 = vpop.f32.mrb[0].mxu0 }
 0x211   :  { %v166_v36 = vadd.f32 %v291_v34, %v165_v35  ;;  %v345_v37 = vpop.f32.mrb[1].mxu0 }
 0x212   :  { %v168_v38 = vpop.f32.mrb[2].mxu0 }
 0x213   :  { %387 = vtanh.f32 %v166_v36  ;;  %v346_v39 = vpop.f32.mrb[3].mxu0 }
 0x21d   :  { %v388_v40 = vpop.eup %387 }
 0x21e   :  { %v172_v41 = vpack.c.bf16 %v388_v40, %v388_v40 }
 0x220   :  { %364 = vmatmul.mubr.bf16.vlgmr.msra.gmra.mrb[0].mxu1 %v172_v41 }
 0x2f3   :  { %v278_v43 = vpop.f32.mrb[0].mxu1 }
 0x2f4   :  { %v279_v44 = vadd.f32 %v300_v42, %v278_v43  ;;  %v365_v45 = vpop.f32.mrb[1].mxu1 }
 0x2f5   :  { %v281_v46 = vpop.f32.mrb[2].mxu1 }
 0x2f6   :  { %284 = vst [vmem:[%s524_s7] sm:$0x3] %v279_v44  ;;  %v366_v47 = vpop.f32.mrb[3].mxu1 }

// kernel: digits_vit_forward.4
= control target key start
LH: loop header
LB: loop body
LE: loop exit
PB: predicated region body
PF: predicated region fallthrough
CT: control target
= control target key end

     0   :  { %s3273_s25 = smov 0   ;;  %s3275_s26 = smov 0   ;;  %s3709_s0 = inlined_call_operand.vmem [shape: f32[2,24,128], index: 0, kind: input, shape index: {}]   ;;  %s3710_s1 = inlined_call_operand.vmem [shape: f32[2,1,128], index: 1, kind: input, shape index: {}]   ;;  %s3711_s2 = inlined_call_operand.vmem [shape: f32[2,1,128], index: 2, kind: input, shape index: {}]   ;;  %s3712_s3 = inlined_call_operand.vmem [shape: bf16[2,128,384], index: 3, kind: input, shape index: {}]   ;;  %s3713_s4 = inlined_call_operand.vmem [shape: f32[2,1,384], index: 4, kind: input, shape index: {}]   ;;  %s3714_s5 = inlined_call_operand.vmem [shape: bf16[2,128,128], index: 5, kind: input, shape index: {}]   ;;  %s3715_s6 = inlined_call_operand.vmem [shape: f32[2,1,128], index: 6, kind: input, shape index: {}]   ;;  %s3716_s7 = inlined_call_operand.vmem [shape: f32[2,1,128], index: 7, kind: input, shape index: {}]   ;;  %s3717_s8 = inlined_call_operand.vmem [shape: f32[2,1,128], index: 8, kind: input, shape index: {}]   ;;  %s3718_s9 = inlined_call_operand.vmem [shape: bf16[2,128,256], index: 9, kind: input, shape index: {}]   ;;  %s3719_s10 = inlined_call_operand.vmem [shape: f32[2,1,256], index: 10, kind: input, shape index: {}]   ;;  %s3720_s11 = inlined_call_operand.vmem [shape: bf16[2,256,128], index: 11, kind: input, shape index: {}]   ;;  %s3721_s12 = inlined_call_operand.vmem [shape: f32[2,1,128], index: 12, kind: input, shape index: {}]   ;;  %s3722_s13 = inlined_call_operand.vmem [shape: f32[2,24,128], index: 13, kind: output, shape index: {}]  }
   0x1   :  { %3727 = sst [smem:[#allocation8_spill]] %s3709_s0  ;;  %s3277_s27 = smov 0  }
   0x2   :  { %3728 = sst [smem:[#allocation9_spill]] %s3711_s2  ;;  %s3279_s28 = smov 0  }
   0x3   :  { %3729 = sst [smem:[#allocation10_spill]] %s3712_s3  ;;  %s3281_s29 = smov 0  }
   0x4   :  { %3730 = sst [smem:[#allocation11_spill]] %s3713_s4 }
   0x5   :  { %3731 = sst [smem:[#allocation12_spill]] %s3714_s5 }
   0x6   :  { %3732 = sst [smem:[#allocation13_spill]] %s3722_s13 }
   0x7 LB: > { %3733 = sst [smem:[#allocation2_spill]] %s3180_s25  ;;  %s32_s30 = sadd.s32 1, %s3188_s27  ;;  %s3196_s29 = sphi %s3281_s29, %s23_s29   ;;  %s3192_s28 = sphi %s3279_s28, %s3756_s28   ;;  %s3188_s27 = sphi %s3277_s27, %s3755_s27   ;;  %s3184_s26 = sphi %s3275_s26, %s3754_s26   ;;  %s3180_s25 = sphi %s3273_s25, %s3753_s25  }
   0x8   : > { %3734 = sst [smem:[#allocation3_spill]] %s3188_s27  ;;  %s35_s14 = sadd.s32 1, %s3192_s28 }
   0x9   : > { %3735 = sst [smem:[#allocation4_spill]] %s3192_s28  ;;  %p33_p0 = scmp.ge.s32.totalorder %s32_s30, 2 }
   0xa   : > { %3736 = sst [smem:[#allocation5_spill]] %s3196_s29  ;;  %p2630_p1 = scmp.ge.s32.totalorder %s3196_s29, 1 }
   0xb   : > { %p505_p2 = scmp.lt.s32.totalorder %s3196_s29, 5  ;;  %s3758_s30 = smov (%p33_p0, %s32_s30), 0 }
   0xc   : > { %3737 = sst [smem:[#allocation6_spill]] %s3758_s30  ;;  %s3760_s14 = smov (!%p33_p0, %s35_s14), %s3192_s28 }
   0xd   : > { %p506_p3 = pnand %p2630_p1, %p505_p2  ;;  %p37_p4 = scmp.ge.s32.totalorder %s3760_s14, 2 }
   0xe   : > { %p595_p5 = scmp.lt.s32.totalorder (!%p506_p3), %s3184_s26, 1  ;;  %p600_p6 = scmp.lt.s32.totalorder (!%p506_p3), %s3180_s25, 1 }
   0xf   : > { %s3762_s14 = smov (%p37_p4, %s3760_s14), 0  ;;  %509 = sbr.rel (%p506_p3) target bundleno = 3912 (0xf48), region = 72 }
  0x10   : > { %3738 = sst [smem:[#allocation7_spill]] %s3762_s14  ;;  %s3740_s0 = sld [smem:[#allocation8_spill]] (!%p506_p3) }
  0x11   : > { %s3741_s3 = sld [smem:[#allocation10_spill]] (!%p506_p3)  ;;  %s3742_s5 = sld [smem:[#allocation12_spill]] (!%p506_p3) }
  0x12   : > { %s3743_s4 = sld [smem:[#allocation11_spill]] (!%p506_p3)  ;;  %s3745_s17 = sld [smem:[#allocation2_spill]] (!%p506_p3) }
  0x16   : > { %s3764_s26 = smov (!%p595_p5, %s3184_s26), 1 }
  0x17   : > { %s3307_s15 = scalar_select %p600_p6, %s3180_s25, 1 }
  0x18   : > { %s2955_s16 = smul.u32 24, %s3764_s26  ;;  %p2641_p7 = scmp.ne.s32.totalorder %s3745_s17, 0 }
  0x19   : > { %s2956_s30 = smul.u32 192, %s3307_s15  ;;  %s2738_s27 = sshll.u32 %s3307_s15, 6 }
  0x1a   : > { %s599_s14 = scalar_lea.vmem %s3740_s0, %s2955_s16  ;;  %s2957_s28 = smul.u32 3, %s3307_s15 }
  0x1b   : > { %s3326_s26 = scalar_lea.vmem %s3741_s3, %s2956_s30  ;;  %s3331_s18 = scalar_lea.vmem %s3742_s5, %s2738_s27  ;;  %v656_v0 = vld [vmem:[%s599_s14] sm:$0xff] (!%p2641_p7)  ;;  %v657_v1 = vld [vmem:[%s599_s14 + $0x8] sm:$0xff] (!%p2641_p7)  ;;  %v658_v2 = vld [vmem:[%s599_s14 + $0x10] sm:$0xff] (!%p2641_p7) }
  0x1c   : > { %s3336_s22 = scalar_lea.vmem %s3743_s4, %s2957_s28  ;;  %s2739_s13 = sshll.u32 %s3307_s15, 7 }
  0x1d   : > { %s2637_s27 = sshll.u32 %s3307_s15, 1  ;;  %s3355_s20 = scalar_lea.vmem %s3718_s9, %s2739_s13 }
  0x1e   : > { %s3360_s23 = scalar_lea.vmem %s3719_s10, %s2637_s27  ;;  %s3365_s0 = scalar_lea.vmem %s3720_s11, %s2739_s13 }
  0x1f   : > { %s645_s30 = scalar_lea.vmem %s3721_s12, %s3307_s15  ;;  %s3744_s4 = sld [smem:[#allocation13_spill]] }
  0x20   : > { %655 = sbr.rel (%p2641_p7) target bundleno = 40 (0x28), region = 76 }
  0x25   : > { %s3374_s5 = scalar_lea.vmem %s3744_s4, %s2955_s16 }
  0x26   : > { %659 = vst [vmem:[%s3374_s5] sm:$0xff] (!%p2641_p7), %v656_v0  ;;  %660 = vst [vmem:[%s3374_s5 + $0x8] sm:$0xff] (!%p2641_p7), %v657_v1 }
  0x27   : > { %661 = vst [vmem:[%s3374_s5 + $0x10] sm:$0xff] %v658_v2 }
  0x28 PF: > { %v3003_v6 = vld [vmem:[%s3326_s26 + $0x4] ss:$12 sps:$4 sm:$0xff]   ;;  %v3005_v7 = vld [vmem:[%s3326_s26] ss:$12 sps:$4 sm:$0xff]   ;;  %v3006_v8 = vld [vmem:[%s3326_s26 + $0x8] ss:$12 sps:$4 sm:$0xff]   ;;  %s3746_s14 = scalar_lea.vmem %s3710_s1, %s3307_s15  ;;  %s3749_s21 = scalar_lea.vmem %s3715_s6, %s3307_s15 }
  0x29   : > { %v3007_v9 = vld [vmem:[%s3326_s26 + $0x1c] ss:$12 sps:$4 sm:$0xff]   ;;  %898 = vmatprep.subr.bf16.mxu0 %v3003_v6  ;;  %2827 = vmatprep.subr.bf16.mxu1 %v3006_v8  ;;  %v3009_v22 = vld [vmem:[%s3326_s26 + $0x18] ss:$12 sps:$4 sm:$0xff]   ;;  %v3010_v23 = vld [vmem:[%s3326_s26 + $0x20] ss:$12 sps:$4 sm:$0xff]   ;;  %s3751_s3 = scalar_lea.vmem %s3717_s8, %s3307_s15 }
  0x2a   : > { %899 = vmatpush1.bf16.msra.mxu0 %v3005_v7  ;;  %2828 = vmatpush3.bf16.msra.mxu1 %v3006_v8  ;;  %v3011_v24 = vld [vmem:[%s3326_s26 + $0x34] ss:$12 sps:$4 sm:$0xff]   ;;  %v3013_v25 = vld [vmem:[%s3326_s26 + $0x30] ss:$12 sps:$4 sm:$0xff]   ;;  %v3014_v26 = vld [vmem:[%s3326_s26 + $0x38] ss:$12 sps:$4 sm:$0xff]  }
  0x2b   : > { %900 = vmatprep.subr.bf16.mxu0 %v3007_v9  ;;  %2829 = vmatprep.subr.bf16.mxu1 %v3010_v23  ;;  %v3015_v27 = vld [vmem:[%s3326_s26 + $0x4c] ss:$12 sps:$4 sm:$0xff]   ;;  %v3017_v28 = vld [vmem:[%s3326_s26 + $0x48] ss:$12 sps:$4 sm:$0xff]   ;;  %v3018_v29 = vld [vmem:[%s3326_s26 + $0x50] ss:$12 sps:$4 sm:$0xff]  }
  0x2c   : > { %v3019_v30 = vld [vmem:[%s3326_s26 + $0x64] ss:$12 sps:$4 sm:$0xff]   ;;  %v3021_v31 = vld [vmem:[%s3326_s26 + $0x60] ss:$12 sps:$4 sm:$0xff]   ;;  %v3022_v32 = vld [vmem:[%s3326_s26 + $0x68] ss:$12 sps:$4 sm:$0xff]  }
  0x2d   : > { %v3023_v33 = vld [vmem:[%s3326_s26 + $0x7c] ss:$12 sps:$4 sm:$0xff]   ;;  %v3026_v34 = vld [vmem:[%s3326_s26 + $0x80] ss:$12 sps:$4 sm:$0xff]   ;;  %v3025_v35 = vld [vmem:[%s3326_s26 + $0x78] ss:$12 sps:$4 sm:$0xff]  }
  0x2e   : > { %v662_v3 = vld [vmem:[%s3374_s5] sm:$0xff]  ;;  %v664_v4 = vld [vmem:[%s3374_s5 + $0x10] sm:$0xff]  ;;  %v663_v5 = vld [vmem:[%s3374_s5 + $0x8] sm:$0xff]  ;;  %901 = vmatpush1.bf16.msra.mxu0 %v3009_v22  ;;  %2830 = vmatpush3.bf16.msra.mxu1 %v3010_v23  ;;  %v3198_v38 = vmov 0   ;;  %vm1026_vm0 = vcmask 261120   ;;  %vm1129_vm1 = vcmask 1043456  }
  0x2f   : > { %667 = vadd.xlane.f32.xlu0 %v662_v3  ;;  %671 = vadd.xlane.f32.xlu1 %v664_v4  ;;  %v3027_v36 = vld [vmem:[%s3326_s26 + $0x94] ss:$12 sps:$4 sm:$0xff]   ;;  %v3030_v37 = vld [vmem:[%s3326_s26 + $0x98] ss:$12 sps:$4 sm:$0xff]   ;;  %v3029_v39 = vld [vmem:[%s3326_s26 + $0x90] ss:$12 sps:$4 sm:$0xff]  }
  0x30   : > { %902 = vmatprep.subr.bf16.mxu0 %v3011_v24  ;;  %2831 = vmatprep.subr.bf16.mxu1 %v3014_v26  ;;  %v3031_v40 = vld [vmem:[%s3326_s26 + $0xac] ss:$12 sps:$4 sm:$0xff]   ;;  %v3034_v41 = vld [vmem:[%s3326_s26 + $0xb0] ss:$12 sps:$4 sm:$0xff]   ;;  %v3033_v42 = vld [vmem:[%s3326_s26 + $0xa8] ss:$12 sps:$4 sm:$0xff]  }
  0x31   : > { %930 = vmatprep.mubr.bf16.mxu0 %v3198_v38  ;;  %v2642_v54 = vld [vmem:[%s3746_s14] ss:$0 sm:$0xff]  ;;  %s3747_s26 = sld [smem:[#allocation9_spill]]  ;;  %vm1087_vm3 = vcmask 195584   ;;  %s3201_s13 = smov 64  }
  0x32   : > { %903 = vmatpush1.bf16.msra.mxu0 %v3013_v25  ;;  %2832 = vmatpush3.bf16.msra.mxu1 %v3014_v26  ;;  %v751_v7 = vld [vmem:[%s3336_s22] sm:$0x7]  ;;  %s3200_s22 = smov 96   ;;  %s3202_s27 = smov 32  }
  0x33   : > { %669 = vadd.xlane.f32.xlu0 %v663_v5  ;;  %904 = vmatprep.subr.bf16.mxu0 %v3015_v27 }
  0x34   : > { %2833 = vmatprep.subr.bf16.mxu1 %v3018_v29 }
  0x36   : > { %905 = vmatpush1.bf16.msra.mxu0 %v3017_v28  ;;  %2834 = vmatpush3.bf16.msra.mxu1 %v3018_v29 }
  0x37   : > { %906 = vmatprep.subr.bf16.mxu0 %v3019_v30  ;;  %2835 = vmatprep.subr.bf16.mxu1 %v3022_v32  ;;  %s3748_s25 = scalar_lea.vmem %s3747_s26, %s3307_s15 }
  0x38   : > { %v2643_v60 = vld [vmem:[%s3748_s25] ss:$0 sm:$0xff] }
  0x3a   : > { %907 = vmatpush1.bf16.msra.mxu0 %v3021_v31  ;;  %2836 = vmatpush3.bf16.msra.mxu1 %v3022_v32 }
  0x3b   : > { %908 = vmatprep.subr.bf16.mxu0 %v3023_v33  ;;  %2837 = vmatprep.subr.bf16.mxu1 %v3026_v34 }
  0x3e   : > { %909 = vmatpush1.bf16.msra.mxu0 %v3025_v35  ;;  %2838 = vmatpush3.bf16.msra.mxu1 %v3026_v34 }
  0x3f   : > { %910 = vmatprep.subr.bf16.mxu0 %v3027_v36  ;;  %2839 = vmatprep.subr.bf16.mxu1 %v3030_v37 }
  0x42   : > { %911 = vmatpush1.bf16.msra.mxu0 %v3029_v39  ;;  %2840 = vmatpush3.bf16.msra.mxu1 %v3030_v37 }
  0x43   : > { %912 = vmatprep.subr.bf16.mxu0 %v3031_v40  ;;  %2841 = vmatprep.subr.bf16.mxu1 %v3034_v41 }
  0x46   : > { %913 = vmatpush1.bf16.msra.mxu0 %v3033_v42  ;;  %2842 = vmatpush3.bf16.msra.mxu1 %v3034_v41 }
  0xbc   : > { %v668_v10 = vpop.xlane.xlu0 %667  ;;  %v672_v11 = vpop.xlane.xlu1 %671 }
  0xbd   : > { %v674_v12 = vmul.f32 0.0078125, %v668_v10  ;;  %v676_v13 = vmul.f32 0.0078125, %v672_v11 }
  0xbf   : > { %v3387_v14 = vsub.f32 %v662_v3, %v674_v12  ;;  %v3389_v15 = vsub.f32 %v664_v4, %v676_v13  ;;  %v755_v4 = vlaneseq }
  0xc0   : > { %v670_v16 = vpop.xlane.xlu0 %669 }
  0xc1   : > { %v675_v17 = vmul.f32 0.0078125, %v670_v16  ;;  %v680_v18 = vmul.f32 %v3387_v14, %v3387_v14  ;;  %v682_v20 = vmul.f32 %v3389_v15, %v3389_v15 }
  0xc3   : > { %v3393_v19 = vsub.f32 %v663_v5, %v675_v17  ;;  %683 = vadd.xlane.f32.xlu1 %v680_v18  ;;  %v3434_v5 = vshrl.u32 %v755_v4, 7 }
  0xc5   : > { %v681_v21 = vmul.f32 %v3393_v19, %v3393_v19  ;;  %v757_v6 = vsub.s32 0, %v3434_v5  ;;  %v761_v8 = vsub.s32 1, %v3434_v5  ;;  %v765_v10 = vsub.s32 2, %v3434_v5 }
  0xc7   : > { %687 = vadd.xlane.f32.xlu1 %v682_v20  ;;  %685 = vadd.xlane.f32.xlu0 %v681_v21  ;;  %v758_v9 = vrot.slane %v751_v7, %v757_v6  ;;  %v762_v12 = vrot.slane %v751_v7, %v761_v8 }
 0x150   : > { %v684_v43 = vpop.xlane.xlu1 %683 }
 0x151   : > { %v689_v44 = vmul.f32 0.0078125, %v684_v43 }
 0x153   : > { %v692_v45 = vadd.f32 1e-12, %v689_v44 }
 0x154   : > { %v688_v46 = vpop.xlane.xlu1 %687  ;;  %v686_v47 = vpop.xlane.xlu0 %685 }
 0x155   : > { %3083 = vrsqrt.f32 %v692_v45  ;;  %v691_v48 = vmul.f32 0.0078125, %v688_v46  ;;  %v690_v49 = vmul.f32 0.0078125, %v686_v47  ;;  %v1001_v47 = vand.u32 127, %v755_v4 }
 0x157   : > { %v694_v50 = vadd.f32 1e-12, %v691_v48  ;;  %v693_v51 = vadd.f32 1e-12, %v690_v49  ;;  %vm1002_vm2 = vcmp.ge.s32.totalorder %v1001_v47, 17  ;;  %v3199_v48 = vmov 0.0  }
 0x158   : > { %v3474_v49 = vsel %vm1002_vm2, -1e+30, %v3199_v48 }
 0x159   : > { %3085 = vrsqrt.f32 %v694_v50 }
 0x15a   : > { %3087 = vrsqrt.f32 %v693_v51 }
 0x15f   : > { %v3084_v52 = vpop.eup %3083 }
 0x160   : > { %v698_v53 = vmul.f32 %v3084_v52, %v3387_v14 }
 0x162   : > { %v707_v59 = vmul.f32 %v2642_v54, %v698_v53 }
 0x163   : > { %v3086_v55 = vpop.eup %3085 }
 0x164   : > { %v3088_v56 = vpop.eup %3087  ;;  %v700_v57 = vmul.f32 %v3086_v55, %v3389_v15  ;;  %v716_v0 = vadd.f32 %v2643_v60, %v707_v59  ;;  %v766_v15 = vrot.slane %v751_v7, %v765_v10 }
 0x165   : > { %v699_v58 = vmul.f32 %v3088_v56, %v3393_v19 }
 0x166   : > { %v709_v61 = vmul.f32 %v2642_v54, %v700_v57 }
 0x167   : > { %v708_v62 = vmul.f32 %v2642_v54, %v699_v58 }
 0x168   : > { %v718_v63 = vadd.f32 %v2643_v60, %v709_v61 }
 0x169   : > { %v717_v1 = vadd.f32 %v2643_v60, %v708_v62 }
 0x16a   : > { %v753_v2 = vpack.c.bf16 %v718_v63, %v718_v63 }
 0x16b   : > { %v752_v3 = vpack.c.bf16 %v717_v1, %v716_v0 }
 0x16d   : > { %931 = vmatmul.mubr.bf16.vlgmr.msra.gmra.mrb[0].mxu0 %v752_v3  ;;  %2843 = vmatprep.mubr.bf16.mxu1 %v752_v3 }
 0x16e   : > { %2844 = vmatmul.mubr.bf16.vlgmr.msra.gmra.mrb[0].mxu1 %v753_v2  ;;  %940 = vmatprep.mubr.bf16.mxu0 %v3198_v38 }
 0x175   : > { %941 = vmatmul.mubr.bf16.gmra.mrb[4].mxu0 %v753_v2 }
 0x240   : > { %v932_v11 = vpop.f32.mrb[0].mxu0 }
 0x241   : > { %v933_v13 = vadd.f32 %v932_v11, %v758_v9  ;;  %v934_v14 = vpop.f32.mrb[1].mxu0  ;;  %v2845_v16 = vpop.f32.mrb[0].mxu1 }
 0x242   : > { %v936_v17 = vpop.f32.mrb[2].mxu0  ;;  %v983_v18 = vpop.f32.mrb[1].mxu1  ;;  %v935_v22 = vadd.f32 %v934_v14, %v762_v12  ;;  %v992_v29 = vadd.f32 %v2845_v16, %v766_v15 }
 0x243   : > { %v937_v19 = vadd.f32 %v936_v17, %v758_v9  ;;  %v938_v20 = vpop.f32.mrb[3].mxu0  ;;  %v2846_v21 = vpop.f32.mrb[2].mxu1  ;;  %v997_v25 = vmul.f32 0.17677669, %v933_v13  ;;  %v984_v27 = vadd.f32 %v983_v18, %v766_v15 }
 0x244   : > { %v939_v23 = vadd.f32 %v938_v20, %v762_v12  ;;  %v986_v24 = vpop.f32.mrb[3].mxu1  ;;  %v3456_v36 = vpack.c.bf16 %v992_v29, %v992_v29  ;;  %v3035_v29 = vld [vmem:[%s3331_s18] sm:$0xff]  }
 0x245   : > { %v998_v26 = vmul.f32 0.17677669, %v937_v19  ;;  %v987_v28 = vadd.f32 %v986_v24, %v766_v15 }
 0x246   : > { %v3444_v30 = vpack.c.bf16 %v939_v23, %v935_v22  ;;  %v1131_v43 = vsel %vm1129_vm1, %v3456_v36, 0 }
 0x247   : > { %v3446_v31 = vpack.c.bf16 %v998_v26, %v997_v25  ;;  %v3448_v32 = vpack.c.bf16 %v987_v28, %v984_v27 }
 0x248   : > { %v942_v33 = vpop.f32.mrb[4].mxu0  ;;  %2943 = vmatprep.subr.msk.bf16.mxu0 %vm1026_vm0, %v3444_v30  ;;  %v1034_v34 = vsel %vm1026_vm0, %v3444_v30, 0 }
 0x249   : > { %v944_v35 = vpop.f32.mrb[5].mxu0  ;;  %2848 = vmatpush3.bf16.xpose.msra.mxu0 %v1034_v34  ;;  %2851 = vmatprep.mubr.msk.bf16.mxu0 %vm1026_vm0, %v3446_v31  ;;  %v943_v42 = vadd.f32 %v942_v33, %v758_v9 }
 0x24a   : > { %v945_v37 = vadd.f32 %v944_v35, %v762_v12  ;;  %2855 = vmatprep.subr.bf16.mxu1 %v3448_v32  ;;  %v946_v39 = vpop.f32.mrb[6].mxu0  ;;  %v3036_v35 = vld [vmem:[%s3331_s18 + $0x8] sm:$0xff]  }
 0x24b   : > { %2856 = vmatpush3.bf16.msra.mxu1 %v3448_v32  ;;  %v947_v40 = vpop.f32.mrb[7].mxu0  ;;  %v999_v45 = vmul.f32 0.17677669, %v943_v42 }
 0x24c   : > { %v3460_v41 = vpack.c.bf16 %v945_v37, %v945_v37  ;;  %2945 = vmatprep.subr.msk.bf16.mxu1 %vm1129_vm1, %v3456_v36 }
 0x24d   : > { %v3470_v46 = vpack.c.bf16 %v999_v45, %v999_v45 }
 0x24e   : > { %2944 = vmatprep.subr.msk.bf16.mxu0 %vm1026_vm0, %v3460_v41  ;;  %v1037_v44 = vsel %vm1026_vm0, %v3460_v41, 0 }
 0x24f   : > { %2858 = vmatpush3.bf16.msra.mxu1 %v1131_v43 }
 0x251   : > { %2850 = vmatpush3.bf16.xpose.msra.mxu0 %v1037_v44 }
 0x258   : > { %2852 = vmatmul.mubr.msk.bf16.vlgmr.msra.gmra.mrb[8].mxu0 %vm1026_vm0, %v3470_v46 }
 0x32b   : > { %v2853_v50 = vpop.f32.mrb[8].mxu0 }
 0x32c   : > { %v1073_v51 = vpop.f32.mrb[9].mxu0  ;;  %v1082_v55 = vadd.f32 %v2853_v50, %v3474_v49 }
 0x32d   : > { %v1074_v52 = vadd.f32 %v1073_v51, %v3474_v49  ;;  %v2854_v53 = vpop.f32.mrb[10].mxu0 }
 0x32e   : > { %v1076_v54 = vpop.f32.mrb[11].mxu0  ;;  %v1094_v59 = vsel %vm1087_vm3, %v1082_v55, -inf }
 0x32f   : > { %v1077_v56 = vadd.f32 %v1076_v54, %v3474_v49  ;;  %v1088_v57 = vsel %vm1087_vm3, %v1074_v52, -inf }
 0x330   : > { %1089 = vmax.xlane.f32.xlu0 %v1088_v57 }
 0x331   : > { %v1091_v58 = vsel %vm1087_vm3, %v1077_v56, -inf }
 0x332   : > { %1092 = vmax.xlane.f32.xlu1 %v1091_v58 }
 0x334   : > { %1095 = vmax.xlane.f32.xlu0 %v1094_v59 }
 0x3bd   : > { %v1090_v60 = vpop.xlane.xlu0 %1089 }
 0x3be   : > { %v1097_v61 = vsub.f32 %v1074_v52, %v1090_v60 }
 0x3bf   : > { %v1093_v62 = vpop.xlane.xlu1 %1092 }
 0x3c0   : > { %v1100_v63 = vmul.f32 1.442695, %v1097_v61  ;;  %v1098_v0 = vsub.f32 %v1077_v56, %v1093_v62 }
 0x3c1   : > { %v1096_v1 = vpop.xlane.xlu0 %1095 }
 0x3c2   : > { %3089 = vpow2.f32 %v1100_v63  ;;  %v1102_v2 = vmul.f32 1.442695, %v1098_v0  ;;  %v1099_v3 = vsub.f32 %v1082_v55, %v1096_v1 }
 0x3c4   : > { %3091 = vpow2.f32 %v1102_v2  ;;  %v1104_v4 = vmul.f32 1.442695, %v1099_v3 }
 0x3c6   : > { %3093 = vpow2.f32 %v1104_v4 }
 0x3cc   : > { %v3090_v7 = vpop.eup %3089 }
 0x3cd   : > { %v1106_v9 = vsel %vm1087_vm3, %v3090_v7, 0.0 }
 0x3ce   : > { %v3092_v10 = vpop.eup %3091  ;;  %1107 = vadd.xlane.f32.xlu1 %v1106_v9 }
 0x3cf   : > { %v1109_v11 = vsel %vm1087_vm3, %v3092_v10, 0.0 }
 0x3d0   : > { %v3094_v12 = vpop.eup %3093  ;;  %1110 = vadd.xlane.f32.xlu0 %v1109_v11 }
 0x3d1   : > { %v1112_v13 = vsel %vm1087_vm3, %v3094_v12, 0.0 }
 0x3d2   : > { %1113 = vadd.xlane.f32.xlu1 %v1112_v13 }
 0x3e3   : > { %1193 = vrot.lane.b32.xlu1 %v3460_v41, %s3200_s22 }
 0x3e6   : > { %1191 = vrot.lane.b32.xlu0 %v3444_v30, %s3200_s22 }
 0x3e7   : > { %1185 = vrot.lane.b32.xlu1 %v3446_v31, %s3200_s22 }
 0x3eb   : > { %1187 = vrot.lane.b32.xlu1 %v3470_v46, %s3200_s22 }
 0x45b   : > { %v1108_v14 = vpop.xlane.xlu1 %1107 }
 0x45c   : > { %3095 = vrcp.f32 %v1108_v14 }
 0x45d   : > { %v1111_v15 = vpop.xlane.xlu0 %1110 }
 0x45e   : > { %3097 = vrcp.f32 %v1111_v15 }
 0x45f   : > { %v1114_v16 = vpop.xlane.xlu1 %1113 }
 0x460   : > { %3099 = vrcp.f32 %v1114_v16 }
 0x461   : > { %v1192_v17 = vpop.permute.xlu0 %1191 }
 0x462   : > { %2946 = vmatprep.subr.msk.bf16.mxu1 %vm1026_vm0, %v1192_v17  ;;  %v1202_v27 = vsel %vm1026_vm0, %v1192_v17, 0  ;;  %v3037_v17 = vld [vmem:[%s3331_s18 + $0x10] sm:$0xff]  }
 0x463   : > { %v1194_v20 = vpop.permute.xlu1 %1193 }
 0x464   : > { %v1205_v33 = vsel %vm1026_vm0, %v1194_v20, 0 }
 0x466   : > { %v3096_v18 = vpop.eup %3095 }
 0x467   : > { %v1118_v21 = vmul.f32 %v3096_v18, %v3090_v7  ;;  %v1186_v28 = vpop.permute.xlu1 %1185 }
 0x468   : > { %v3098_v19 = vpop.eup %3097 }
 0x469   : > { %v1119_v22 = vmul.f32 %v3098_v19, %v3092_v10 }
 0x46a   : > { %v3100_v23 = vpop.eup %3099 }
 0x46b   : > { %v1120_v24 = vmul.f32 %v3100_v23, %v3094_v12  ;;  %v1121_v25 = vpack.c.bf16 %v1119_v22, %v1118_v21  ;;  %v1188_v34 = vpop.permute.xlu1 %1187 }
 0x46d   : > { %2859 = vmatprep.mubr.msk.bf16.mxu1 %vm1087_vm3, %v1121_v25  ;;  %v1122_v26 = vpack.c.bf16 %v1120_v24, %v1120_v24 }
 0x46f   : > { %2860 = vmatmul.mubr.msk.bf16.vlgmr.msra.gmra.mrb[4].mxu1 %vm1087_vm3, %v1122_v26  ;;  %v3038_v26 = vld [vmem:[%s3331_s18 + $0x18] sm:$0xff]  }
 0x470   : > { %2864 = vmatpush3.bf16.xpose.msra.mxu1 %v1202_v27  ;;  %2867 = vmatprep.mubr.msk.bf16.mxu1 %vm1026_vm0, %v1186_v28 }
 0x471   : > { %2947 = vmatprep.subr.msk.bf16.mxu1 %vm1026_vm0, %v1194_v20 }
 0x478   : > { %2866 = vmatpush3.bf16.xpose.msra.mxu1 %v1205_v33 }
 0x479   : > { %2887 = vmatprep.subr.bf16.mxu1 %v3035_v29 }
 0x47f   : > { %2868 = vmatmul.mubr.msk.bf16.vlgmr.msra.gmra.mrb[8].mxu1 %vm1026_vm0, %v1188_v34 }
 0x480   : > { %2888 = vmatpush3.bf16.msra.mxu1 %v3035_v29 }
 0x481   : > { %2889 = vmatprep.subr.bf16.mxu1 %v3036_v35 }
 0x484   : > { %2890 = vmatpush3.bf16.msra.mxu1 %v3036_v35 }
 0x542   : > { %v2861_v37 = vpop.f32.mrb[4].mxu1 }
 0x543   : > { %v1167_v39 = vpop.f32.mrb[5].mxu1  ;;  %v1182_v44 = vpack.c.bf16 %v2861_v37, %v2861_v37 }
 0x544   : > { %v2862_v40 = vpop.f32.mrb[6].mxu1 }
 0x545   : > { %v1170_v42 = vpop.f32.mrb[7].mxu1 }
 0x546   : > { %v1181_v43 = vpack.c.bf16 %v1170_v42, %v1167_v39 }
 0x548   : > { %2891 = vmatprep.mubr.msk.bf16.mxu1 %vm1026_vm0, %v1181_v43 }
 0x549   : > { %2892 = vmatmul.mubr.msk.bf16.vlgmr.msra.gmra.mrb[12].mxu1 %vm1026_vm0, %v1182_v44 }
 0x552   : > { %v2869_v45 = vpop.f32.mrb[8].mxu1 }
 0x553   : > { %v1241_v47 = vpop.f32.mrb[9].mxu1  ;;  %v1250_v52 = vadd.f32 %v2869_v45, %v3474_v49 }
 0x554   : > { %v1242_v48 = vadd.f32 %v1241_v47, %v3474_v49  ;;  %v2870_v50 = vpop.f32.mrb[10].mxu1 }
 0x555   : > { %v1244_v51 = vpop.f32.mrb[11].mxu1  ;;  %v1261_v56 = vsel %vm1087_vm3, %v1250_v52, -inf }
 0x556   : > { %v1245_v53 = vadd.f32 %v1244_v51, %v3474_v49  ;;  %v1255_v54 = vsel %vm1087_vm3, %v1242_v48, -inf }
 0x557   : > { %1256 = vmax.xlane.f32.xlu0 %v1255_v54 }
 0x558   : > { %v1258_v55 = vsel %vm1087_vm3, %v1245_v53, -inf }
 0x559   : > { %1259 = vmax.xlane.f32.xlu1 %v1258_v55 }
 0x55b   : > { %1262 = vmax.xlane.f32.xlu0 %v1261_v56 }
 0x5e4   : > { %v1257_v57 = vpop.xlane.xlu0 %1256 }
 0x5e5   : > { %v1264_v58 = vsub.f32 %v1242_v48, %v1257_v57 }
 0x5e6   : > { %v1260_v59 = vpop.xlane.xlu1 %1259 }
 0x5e7   : > { %v1267_v60 = vmul.f32 1.442695, %v1264_v58  ;;  %v1265_v61 = vsub.f32 %v1245_v53, %v1260_v59 }
 0x5e8   : > { %v1263_v62 = vpop.xlane.xlu0 %1262 }
 0x5e9   : > { %3101 = vpow2.f32 %v1267_v60  ;;  %v1269_v63 = vmul.f32 1.442695, %v1265_v61  ;;  %v1266_v0 = vsub.f32 %v1250_v52, %v1263_v62 }
 0x5eb   : > { %3103 = vpow2.f32 %v1269_v63  ;;  %v1271_v1 = vmul.f32 1.442695, %v1266_v0 }
 0x5ed   : > { %3105 = vpow2.f32 %v1271_v1 }
 0x5f3   : > { %v3102_v2 = vpop.eup %3101 }
 0x5f4   : > { %v1273_v3 = vsel %vm1087_vm3, %v3102_v2, 0.0 }
 0x5f5   : > { %v3104_v4 = vpop.eup %3103  ;;  %1274 = vadd.xlane.f32.xlu0 %v1273_v3 }
 0x5f6   : > { %v1276_v9 = vsel %vm1087_vm3, %v3104_v4, 0.0 }
 0x5f7   : > { %v3106_v7 = vpop.eup %3105 }
 0x5f8   : > { %v1279_v10 = vsel %vm1087_vm3, %v3106_v7, 0.0 }
 0x5f9   : > { %1277 = vadd.xlane.f32.xlu0 %v1276_v9  ;;  %1280 = vadd.xlane.f32.xlu1 %v1279_v10 }
 0x60a   : > { %1294 = vrot.lane.b32.xlu1 %v3456_v36, %s3200_s22 }
 0x60e   : > { %1492 = vrot.lane.b32.xlu1 %v3444_v30, %s3201_s13 }
 0x60f   : > { %1292 = vrot.lane.b32.xlu0 %v3448_v32, %s3200_s22 }
 0x612   : > { %1494 = vrot.lane.b32.xlu1 %v3460_v41, %s3201_s13 }
 0x613   : > { %1488 = vrot.lane.b32.xlu0 %v3446_v31, %s3201_s13 }
 0x616   : > { %1490 = vrot.lane.b32.xlu1 %v3470_v46, %s3201_s13 }
 0x617   : > { %1728 = vrot.lane.b32.xlu0 %v3444_v30, %s3202_s27 }
 0x61a   : > { %1730 = vrot.lane.b32.xlu1 %v3460_v41, %s3202_s27 }
 0x61b   : > { %1724 = vrot.lane.b32.xlu0 %v3446_v31, %s3202_s27 }
 0x61c   : > { %v3532_v11 = vpop.f32.mrb[12].mxu1 }
 0x61d   : > { %v3534_v12 = vpop.f32.mrb[13].mxu1 }
 0x61e   : > { %1726 = vrot.lane.b32.xlu1 %v3470_v46, %s3202_s27  ;;  %v2894_v13 = vpop.f32.mrb[14].mxu1 }
 0x61f   : > { %v3538_v14 = vpop.f32.mrb[15].mxu1 }
 0x682   : > { %v1275_v15 = vpop.xlane.xlu0 %1274 }
 0x683   : > { %3107 = vrcp.f32 %v1275_v15 }
 0x686   : > { %v1281_v30 = vpop.xlane.xlu1 %1280  ;;  %v1278_v16 = vpop.xlane.xlu0 %1277 }
 0x687   : > { %3109 = vrcp.f32 %v1281_v30 }
 0x688   : > { %3111 = vrcp.f32 %v1278_v16 }
 0x68a   : > { %v1293_v41 = vpop.permute.xlu0 %1292  ;;  %v1295_v31 = vpop.permute.xlu1 %1294 }
 0x68b   : > { %2871 = vmatprep.subr.bf16.mxu0 %v1293_v41  ;;  %v1304_v18 = vsel %vm1129_vm1, %v1295_v31, 0 }
 0x68c   : > { %2872 = vmatpush3.bf16.msra.mxu0 %v1293_v41 }
 0x68d   : > { %2948 = vmatprep.subr.msk.bf16.mxu0 %vm1129_vm1, %v1295_v31  ;;  %v3108_v46 = vpop.eup %3107 }
 0x68e   : > { %v1285_v22 = vmul.f32 %v3108_v46, %v3102_v2  ;;  %v1493_v27 = vpop.permute.xlu1 %1492  ;;  %v1489_v40 = vpop.permute.xlu0 %1488 }
 0x68f   : > { %v1503_v39 = vsel %vm1026_vm0, %v1493_v27, 0 }
 0x690   : > { %2874 = vmatpush3.bf16.msra.mxu0 %v1304_v18 }
 0x691   : > { %v3110_v19 = vpop.eup %3109  ;;  %2879 = vmatprep.subr.bf16.mxu0 %v3037_v17 }
 0x692   : > { %v3112_v20 = vpop.eup %3111  ;;  %v1287_v21 = vmul.f32 %v3110_v19, %v3106_v7  ;;  %v1495_v42 = vpop.permute.xlu1 %1494 }
 0x693   : > { %v1286_v23 = vmul.f32 %v3112_v20, %v3104_v4  ;;  %v1506_v43 = vsel %vm1026_vm0, %v1495_v42, 0  ;;  %v1729_v44 = vpop.permute.xlu0 %1728 }
 0x694   : > { %v1289_v24 = vpack.c.bf16 %v1287_v21, %v1287_v21  ;;  %v1739_v47 = vsel %vm1026_vm0, %v1729_v44, 0 }
 0x695   : > { %v1288_v25 = vpack.c.bf16 %v1286_v23, %v1285_v22 }
 0x696   : > { %v1491_v45 = vpop.permute.xlu1 %1490 }
 0x697   : > { %2875 = vmatprep.mubr.msk.bf16.mxu0 %vm1087_vm3, %v1288_v25  ;;  %v1725_v48 = vpop.permute.xlu0 %1724 }
 0x698   : > { %2876 = vmatmul.mubr.msk.bf16.vlgmr.msra.gmra.mrb[12].mxu0 %vm1087_vm3, %v1289_v24 }
 0x699   : > { %2880 = vmatpush3.bf16.msra.mxu0 %v3037_v17 }
 0x69a   : > { %2881 = vmatprep.subr.bf16.mxu0 %v3038_v26  ;;  %v1731_v50 = vpop.permute.xlu1 %1730 }
 0x69b   : > { %v1742_v51 = vsel %vm1026_vm0, %v1731_v50, 0 }
 0x69d   : > { %2882 = vmatpush3.bf16.msra.mxu0 %v3038_v26 }
 0x69e   : > { %2949 = vmatprep.subr.msk.bf16.mxu0 %vm1026_vm0, %v1493_v27  ;;  %v1727_v52 = vpop.permute.xlu1 %1726 }
 0x76b   : > { %v2877_v28 = vpop.f32.mrb[12].mxu0 }
 0x76c   : > { %v1340_v29 = vpop.f32.mrb[13].mxu0  ;;  %v1355_v37 = vpack.c.bf16 %v2877_v28, %v2877_v28 }
 0x76d   : > { %v2878_v33 = vpop.f32.mrb[14].mxu0 }
 0x76e   : > { %v1343_v34 = vpop.f32.mrb[15].mxu0 }
 0x76f   : > { %v1354_v35 = vpack.c.bf16 %v1343_v34, %v1340_v29 }
 0x771   : > { %2883 = vmatprep.mubr.msk.bf16.mxu0 %vm1026_vm0, %v1354_v35 }
 0x772   : > { %2884 = vmatmul.mubr.msk.bf16.vlgmr.msra.gmra.mrb[16].mxu0 %vm1026_vm0, %v1355_v37 }
 0x773   : > { %2896 = vmatpush3.bf16.xpose.msra.mxu0 %v1503_v39  ;;  %2899 = vmatprep.mubr.msk.bf16.mxu0 %vm1026_vm0, %v1489_v40 }
 0x774   : > { %2950 = vmatprep.subr.msk.bf16.mxu0 %vm1026_vm0, %v1495_v42 }
 0x77b   : > { %2898 = vmatpush3.bf16.xpose.msra.mxu0 %v1506_v43 }
 0x77c   : > { %2952 = vmatprep.subr.msk.bf16.mxu0 %vm1026_vm0, %v1729_v44 }
 0x782   : > { %2900 = vmatmul.mubr.msk.bf16.vlgmr.msra.gmra.mrb[20].mxu0 %vm1026_vm0, %v1491_v45 }
 0x783   : > { %2920 = vmatpush3.bf16.xpose.msra.mxu0 %v1739_v47  ;;  %2923 = vmatprep.mubr.msk.bf16.mxu0 %vm1026_vm0, %v1725_v48 }
 0x784   : > { %2953 = vmatprep.subr.msk.bf16.mxu0 %vm1026_vm0, %v1731_v50 }
 0x78b   : > { %2922 = vmatpush3.bf16.xpose.msra.mxu0 %v1742_v51 }
 0x792   : > { %2924 = vmatmul.mubr.msk.bf16.vlgmr.msra.gmra.mrb[24].mxu0 %vm1026_vm0, %v1727_v52 }
 0x793   : > { %2168 = vmatprep.mubr.bf16.mxu0 %v3198_v38 }
 0x845   : > { %v2885_v53 = vpop.f32.mrb[16].mxu0 }
 0x846   : > { %v3562_v54 = vadd.f32 %v3532_v11, %v2885_v53  ;;  %v1408_v55 = vpop.f32.mrb[17].mxu0 }
 0x847   : > { %v3565_v56 = vadd.f32 %v3534_v12, %v1408_v55  ;;  %v2886_v57 = vpop.f32.mrb[18].mxu0 }
 0x848   : > { %v1411_v58 = vpop.f32.mrb[19].mxu0 }
 0x849   : > { %v3568_v59 = vadd.f32 %v3538_v14, %v1411_v58 }
 0x855   : > { %v2901_v60 = vpop.f32.mrb[20].mxu0 }
 0x856   : > { %v1542_v61 = vpop.f32.mrb[21].mxu0  ;;  %v1551_v1 = vadd.f32 %v2901_v60, %v3474_v49 }
 0x857   : > { %v1543_v62 = vadd.f32 %v1542_v61, %v3474_v49  ;;  %v2902_v63 = vpop.f32.mrb[22].mxu0 }
 0x858   : > { %v1545_v0 = vpop.f32.mrb[23].mxu0  ;;  %v1562_v7 = vsel %vm1087_vm3, %v1551_v1, -inf }
 0x859   : > { %v1546_v2 = vadd.f32 %v1545_v0, %v3474_v49  ;;  %v1556_v3 = vsel %vm1087_vm3, %v1543_v62, -inf }
 0x85a   : > { %1557 = vmax.xlane.f32.xlu0 %v1556_v3 }
 0x85b   : > { %v1559_v4 = vsel %vm1087_vm3, %v1546_v2, -inf }
 0x85c   : > { %1560 = vmax.xlane.f32.xlu1 %v1559_v4 }
 0x85e   : > { %1563 = vmax.xlane.f32.xlu0 %v1562_v7 }
 0x865   : > { %v2925_v9 = vpop.f32.mrb[24].mxu0 }
 0x866   : > { %v1778_v10 = vpop.f32.mrb[25].mxu0  ;;  %v1787_v26 = vadd.f32 %v2925_v9, %v3474_v49  ;;  %v3040_v9 = vld [vmem:[%s3331_s18 + $0x28] sm:$0xff]  }
 0x867   : > { %v2926_v11 = vpop.f32.mrb[26].mxu0  ;;  %v1779_v24 = vadd.f32 %v1778_v10, %v3474_v49 }
 0x868   : > { %v1781_v12 = vpop.f32.mrb[27].mxu0  ;;  %v1798_v29 = vsel %vm1087_vm3, %v1787_v26, -inf }
 0x869   : > { %v1782_v25 = vadd.f32 %v1781_v12, %v3474_v49  ;;  %v1792_v28 = vsel %vm1087_vm3, %v1779_v24, -inf  ;;  %v3039_v49 = vld [vmem:[%s3331_s18 + $0x20] sm:$0xff]  }
 0x86b   : > { %v1795_v27 = vsel %vm1087_vm3, %v1782_v25, -inf }
 0x8e7   : > { %v1558_v13 = vpop.xlane.xlu0 %1557 }
 0x8e8   : > { %v1565_v14 = vsub.f32 %v1543_v62, %v1558_v13 }
 0x8e9   : > { %v1561_v15 = vpop.xlane.xlu1 %1560 }
 0x8ea   : > { %v1568_v30 = vmul.f32 1.442695, %v1565_v14  ;;  %v1566_v16 = vsub.f32 %v1546_v2, %v1561_v15 }
 0x8eb   : > { %v1564_v41 = vpop.xlane.xlu0 %1563 }
 0x8ec   : > { %3113 = vpow2.f32 %v1568_v30  ;;  %v1570_v31 = vmul.f32 1.442695, %v1566_v16  ;;  %v1567_v17 = vsub.f32 %v1551_v1, %v1564_v41 }
 0x8ee   : > { %3115 = vpow2.f32 %v1570_v31  ;;  %v1572_v18 = vmul.f32 1.442695, %v1567_v17 }
 0x8f0   : > { %3117 = vpow2.f32 %v1572_v18 }
 0x8f6   : > { %v3114_v46 = vpop.eup %3113 }
 0x8f7   : > { %v1574_v19 = vsel %vm1087_vm3, %v3114_v46, 0.0 }
 0x8f8   : > { %v3116_v20 = vpop.eup %3115  ;;  %1575 = vadd.xlane.f32.xlu0 %v1574_v19 }
 0x8f9   : > { %v1577_v22 = vsel %vm1087_vm3, %v3116_v20, 0.0 }
 0x8fa   : > { %v3118_v21 = vpop.eup %3117 }
 0x8fb   : > { %v1580_v23 = vsel %vm1087_vm3, %v3118_v21, 0.0 }
 0x8fc   : > { %1578 = vadd.xlane.f32.xlu0 %v1577_v22  ;;  %1581 = vadd.xlane.f32.xlu1 %v1580_v23 }
 0x90d   : > { %1593 = vrot.lane.b32.xlu1 %v3456_v36, %s3201_s13 }
 0x912   : > { %1591 = vrot.lane.b32.xlu0 %v3448_v32, %s3201_s13 }
 0x931   : > { %1796 = vmax.xlane.f32.xlu0 %v1795_v27  ;;  %1793 = vmax.xlane.f32.xlu1 %v1792_v28 }
 0x935   : > { %1799 = vmax.xlane.f32.xlu0 %v1798_v29 }
 0x985   : > { %v1576_v33 = vpop.xlane.xlu0 %1575 }
 0x986   : > { %3119 = vrcp.f32 %v1576_v33 }
 0x989   : > { %v1582_v34 = vpop.xlane.xlu1 %1581  ;;  %v1579_v35 = vpop.xlane.xlu0 %1578 }
 0x98a   : > { %3121 = vrcp.f32 %v1582_v34 }
 0x98b   : > { %3123 = vrcp.f32 %v1579_v35 }
 0x98d   : > { %v1592_v37 = vpop.permute.xlu0 %1591  ;;  %v1594_v39 = vpop.permute.xlu1 %1593 }
 0x98e   : > { %2903 = vmatprep.subr.bf16.mxu1 %v1592_v37  ;;  %v1603_v40 = vsel %vm1129_vm1, %v1594_v39, 0 }
 0x98f   : > { %2904 = vmatpush3.bf16.msra.mxu1 %v1592_v37 }
 0x990   : > { %2951 = vmatprep.subr.msk.bf16.mxu1 %vm1129_vm1, %v1594_v39  ;;  %v3120_v42 = vpop.eup %3119 }
 0x991   : > { %v1586_v47 = vmul.f32 %v3120_v42, %v3114_v46 }
 0x993   : > { %2906 = vmatpush3.bf16.msra.mxu1 %v1603_v40 }
 0x994   : > { %v3122_v43 = vpop.eup %3121  ;;  %2911 = vmatprep.subr.bf16.mxu1 %v3039_v49 }
 0x995   : > { %v3124_v44 = vpop.eup %3123  ;;  %v1588_v45 = vmul.f32 %v3122_v43, %v3118_v21 }
 0x996   : > { %v1587_v48 = vmul.f32 %v3124_v44, %v3116_v20 }
 0x997   : > { %v1590_v50 = vpack.c.bf16 %v1588_v45, %v1588_v45 }
 0x998   : > { %v1589_v51 = vpack.c.bf16 %v1587_v48, %v1586_v47  ;;  %v2700_v48 = vld [vmem:[%s3749_s21] ss:$0 sm:$0xff] }
 0x99a   : > { %2907 = vmatprep.mubr.msk.bf16.mxu1 %vm1087_vm3, %v1589_v51 }
 0x99b   : > { %2908 = vmatmul.mubr.msk.bf16.vlgmr.msra.gmra.mrb[16].mxu1 %vm1087_vm3, %v1590_v50  ;;  %v3155_v50 = vld [vmem:[%s3374_s5] sm:$0xff] }
 0x99c   : > { %2912 = vmatpush3.bf16.msra.mxu1 %v3039_v49 }
 0x99d   : > { %2913 = vmatprep.subr.bf16.mxu1 %v3040_v9 }
 0x9a0   : > { %2914 = vmatpush3.bf16.msra.mxu1 %v3040_v9 }
 0x9be   : > { %v1794_v52 = vpop.xlane.xlu1 %1793  ;;  %v1797_v53 = vpop.xlane.xlu0 %1796 }
 0x9bf   : > { %v1802_v55 = vsub.f32 %v1782_v25, %v1797_v53  ;;  %v1801_v57 = vsub.f32 %v1779_v24, %v1794_v52  ;;  %v3041_v24 = vld [vmem:[%s3331_s18 + $0x30] sm:$0xff]   ;;  %v3042_v25 = vld [vmem:[%s3331_s18 + $0x38] sm:$0xff]   ;;  %v3156_v53 = vld [vmem:[%s3374_s5 + $0x8] sm:$0xff] }
 0x9c1   : > { %v1806_v58 = vmul.f32 1.442695, %v1802_v55  ;;  %v1804_v62 = vmul.f32 1.442695, %v1801_v57 }
 0x9c2   : > { %v1800_v60 = vpop.xlane.xlu0 %1799 }
 0x9c3   : > { %v1803_v61 = vsub.f32 %v1787_v26, %v1800_v60  ;;  %3125 = vpow2.f32 %v1806_v58  ;;  %v3157_v58 = vld [vmem:[%s3374_s5 + $0x10] sm:$0xff] }
 0x9c5   : > { %v1808_v63 = vmul.f32 1.442695, %v1803_v61 }
 0x9c7   : > { %3127 = vpow2.f32 %v1808_v63  ;;  %v3043_v63 = vld [vmem:[%s3355_s20] ss:$8 sps:$4 sm:$0xff]  }
 0x9c8   : > { %3129 = vpow2.f32 %v1804_v62 }
 0x9cd   : > { %v3126_v0 = vpop.eup %3125 }
 0x9ce   : > { %v1813_v1 = vsel %vm1087_vm3, %v3126_v0, 0.0 }
 0x9cf   : > { %1814 = vadd.xlane.f32.xlu0 %v1813_v1  ;;  %v3048_v1 = vld [vmem:[%s3355_s20 + $0x14] ss:$8 sps:$4 sm:$0xff]  }
 0x9d1   : > { %v3128_v2 = vpop.eup %3127 }
 0x9d2   : > { %v1816_v3 = vsel %vm1087_vm3, %v3128_v2, 0.0  ;;  %v3130_v4 = vpop.eup %3129 }
 0x9d3   : > { %1817 = vadd.xlane.f32.xlu1 %v1816_v3  ;;  %v1810_v7 = vsel %vm1087_vm3, %v3130_v4, 0.0 }
 0x9d7   : > { %1811 = vadd.xlane.f32.xlu1 %v1810_v7 }
 0x9e5   : > { %1827 = vrot.lane.b32.xlu0 %v3448_v32, %s3202_s27 }
 0x9e8   : > { %1829 = vrot.lane.b32.xlu1 %v3456_v36, %s3202_s27 }
 0xa5c   : > { %v1815_v10 = vpop.xlane.xlu0 %1814 }
 0xa5d   : > { %3131 = vrcp.f32 %v1815_v10 }
 0xa60   : > { %v1818_v11 = vpop.xlane.xlu1 %1817  ;;  %v1828_v12 = vpop.permute.xlu0 %1827 }
 0xa61   : > { %2927 = vmatprep.subr.bf16.mxu1 %v1828_v12 }
 0xa64   : > { %v1812_v13 = vpop.xlane.xlu1 %1811 }
 0xa65   : > { %3133 = vrcp.f32 %v1812_v13 }
 0xa66   : > { %3135 = vrcp.f32 %v1818_v11 }
 0xa67   : > { %v3132_v14 = vpop.eup %3131 }
 0xa68   : > { %v1823_v17 = vmul.f32 %v3132_v14, %v3126_v0  ;;  %v1830_v20 = vpop.permute.xlu1 %1829  ;;  %v3045_v0 = vld [vmem:[%s3355_s20 + $0x4] ss:$8 sps:$4 sm:$0xff]  }
 0xa69   : > { %v1839_v22 = vsel %vm1129_vm1, %v1830_v20, 0  ;;  %2136 = vmatprep.subr.bf16.mxu0 %v3045_v0  ;;  %v3073_v0 = vld [vmem:[%s3365_s0 + $0x58] sm:$0xff]  }
 0xa6a   : > { %2137 = vmatpush1.bf16.msra.mxu0 %v3043_v63  ;;  %v3071_v63 = vld [vmem:[%s3365_s0 + $0x50] sm:$0xff]  }
 0xa6b   : > { %2138 = vmatprep.subr.bf16.mxu0 %v3048_v1  ;;  %v3074_v1 = vld [vmem:[%s3365_s0 + $0x18] sm:$0xff]  }
 0xa6e   : > { %v2909_v15 = vpop.f32.mrb[16].mxu1 }
 0xa6f   : > { %v3134_v30 = vpop.eup %3133  ;;  %v1639_v16 = vpop.f32.mrb[17].mxu1  ;;  %v1654_v36 = vpack.c.bf16 %v2909_v15, %v2909_v15 }
 0xa70   : > { %v2910_v41 = vpop.f32.mrb[18].mxu1  ;;  %v1822_v31 = vmul.f32 %v3134_v30, %v3130_v4  ;;  %v3136_v19 = vpop.eup %3135 }
 0xa71   : > { %v1642_v18 = vpop.f32.mrb[19].mxu1  ;;  %v1824_v21 = vmul.f32 %v3136_v19, %v3128_v2  ;;  %v3046_v2 = vld [vmem:[%s3355_s20 + $0x10] ss:$8 sps:$4 sm:$0xff]   ;;  %v3051_v41 = vld [vmem:[%s3355_s20 + $0x24] ss:$8 sps:$4 sm:$0xff]  }
 0xa72   : > { %v1653_v32 = vpack.c.bf16 %v1642_v18, %v1639_v16  ;;  %v1825_v46 = vpack.c.bf16 %v1823_v17, %v1822_v31  ;;  %2139 = vmatpush1.bf16.msra.mxu0 %v3046_v2  ;;  %v3049_v31 = vld [vmem:[%s3355_s20 + $0x20] ss:$8 sps:$4 sm:$0xff]   ;;  %v3054_v17 = vld [vmem:[%s3355_s20 + $0x34] ss:$8 sps:$4 sm:$0xff]   ;;  %v3052_v18 = vld [vmem:[%s3355_s20 + $0x30] ss:$8 sps:$4 sm:$0xff]  }
 0xa73   : > { %v1826_v23 = vpack.c.bf16 %v1824_v21, %v1824_v21  ;;  %2140 = vmatprep.subr.bf16.mxu0 %v3051_v41  ;;  %v3058_v19 = vld [vmem:[%s3355_s20 + $0x50] ss:$8 sps:$4 sm:$0xff]   ;;  %v3061_v21 = vld [vmem:[%s3355_s20 + $0x60] ss:$8 sps:$4 sm:$0xff]  }
 0xa74   : > { %2915 = vmatprep.mubr.msk.bf16.mxu1 %vm1026_vm0, %v1653_v32  ;;  %v3057_v32 = vld [vmem:[%s3355_s20 + $0x44] ss:$8 sps:$4 sm:$0xff]  }
 0xa75   : > { %2916 = vmatmul.mubr.msk.bf16.vlgmr.msra.gmra.mrb[20].mxu1 %vm1026_vm0, %v1654_v36  ;;  %v3060_v36 = vld [vmem:[%s3355_s20 + $0x54] ss:$8 sps:$4 sm:$0xff]   ;;  %v3075_v2 = vld [vmem:[%s3365_s0 + $0x60] sm:$0xff]  }
 0xa76   : > { %2928 = vmatpush3.bf16.msra.mxu1 %v1828_v12  ;;  %2931 = vmatprep.mubr.msk.bf16.mxu1 %vm1087_vm3, %v1825_v46  ;;  %v3055_v46 = vld [vmem:[%s3355_s20 + $0x40] ss:$8 sps:$4 sm:$0xff]  }
 0xa77   : > { %2954 = vmatprep.subr.msk.bf16.mxu1 %vm1129_vm1, %v1830_v20  ;;  %2141 = vmatpush1.bf16.msra.mxu0 %v3049_v31  ;;  %v3063_v20 = vld [vmem:[%s3355_s20 + $0x64] ss:$8 sps:$4 sm:$0xff]  }
 0xa78   : > { %2142 = vmatprep.subr.bf16.mxu0 %v3054_v17 }
 0xa7a   : > { %2930 = vmatpush3.bf16.msra.mxu1 %v1839_v22  ;;  %v3066_v22 = vld [vmem:[%s3355_s20 + $0x74] ss:$8 sps:$4 sm:$0xff]  }
 0xa7b   : > { %2935 = vmatprep.subr.bf16.mxu1 %v3041_v24  ;;  %2143 = vmatpush1.bf16.msra.mxu0 %v3052_v18 }
 0xa7c   : > { %2144 = vmatprep.subr.bf16.mxu0 %v3057_v32 }
 0xa7d   : > { %2932 = vmatmul.mubr.msk.bf16.vlgmr.msra.gmra.mrb[24].mxu1 %vm1087_vm3, %v1826_v23  ;;  %v3064_v23 = vld [vmem:[%s3355_s20 + $0x70] ss:$8 sps:$4 sm:$0xff]   ;;  %s3750_s20 = scalar_lea.vmem %s3716_s7, %s3307_s15 }
 0xa7e   : > { %2936 = vmatpush3.bf16.msra.mxu1 %v3041_v24 }
 0xa7f   : > { %2937 = vmatprep.subr.bf16.mxu1 %v3042_v25  ;;  %2145 = vmatpush1.bf16.msra.mxu0 %v3055_v46 }
 0xa80   : > { %2146 = vmatprep.subr.bf16.mxu0 %v3060_v36 }
 0xa82   : > { %2938 = vmatpush3.bf16.msra.mxu1 %v3042_v25 }
 0xa83   : > { %2147 = vmatpush1.bf16.msra.mxu0 %v3058_v19 }
 0xa84   : > { %2148 = vmatprep.subr.bf16.mxu0 %v3063_v20 }
 0xa87   : > { %2149 = vmatpush1.bf16.msra.mxu0 %v3061_v21 }
 0xa88   : > { %2150 = vmatprep.subr.bf16.mxu0 %v3066_v22 }
 0xa8b   : > { %2151 = vmatpush1.bf16.msra.mxu0 %v3064_v23 }
 0xb48   : > { %v2917_v26 = vpop.f32.mrb[20].mxu1 }
 0xb49   : > { %v1723_v27 = vadd.f32 %v2917_v26, %v3562_v54  ;;  %v1707_v28 = vpop.f32.mrb[21].mxu1 }
 0xb4a   : > { %v1721_v29 = vadd.f32 %v1707_v28, %v3565_v56  ;;  %v2918_v33 = vpop.f32.mrb[22].mxu1 }
 0xb4b   : > { %v1710_v34 = vpop.f32.mrb[23].mxu1 }
 0xb4c   : > { %v1722_v35 = vadd.f32 %v1710_v34, %v3568_v59 }
 0xb50   : > { %v2933_v37 = vpop.f32.mrb[24].mxu1 }
 0xb51   : > { %v1875_v39 = vpop.f32.mrb[25].mxu1  ;;  %v1890_v43 = vpack.c.bf16 %v2933_v37, %v2933_v37 }
 0xb52   : > { %v2934_v49 = vpop.f32.mrb[26].mxu1 }
 0xb53   : > { %v1878_v40 = vpop.f32.mrb[27].mxu1 }
 0xb54   : > { %v1889_v42 = vpack.c.bf16 %v1878_v40, %v1875_v39  ;;  %v2701_v39 = vld [vmem:[%s3750_s20] ss:$0 sm:$0xff] }
 0xb56   : > { %2939 = vmatprep.mubr.msk.bf16.mxu1 %vm1026_vm0, %v1889_v42 }
 0xb57   : > { %2940 = vmatmul.mubr.msk.bf16.vlgmr.msra.gmra.mrb[28].mxu1 %vm1026_vm0, %v1890_v43 }
 0xc2a   : > { %v2941_v54 = vpop.f32.mrb[28].mxu1 }
 0xc2b   : > { %v1959_v56 = vadd.f32 %v2941_v54, %v1723_v27  ;;  %v1943_v44 = vpop.f32.mrb[29].mxu1  ;;  %v2702_v54 = vld [vmem:[%s3751_s3] ss:$0 sm:$0xff] }
 0xc2c   : > { %v1957_v45 = vadd.f32 %v1943_v44, %v1721_v29  ;;  %v2942_v47 = vpop.f32.mrb[30].mxu1 }
 0xc2d   : > { %v1946_v59 = vpop.f32.mrb[31].mxu1  ;;  %v1962_v60 = vadd.f32 %v3157_v58, %v1959_v56  ;;  %v3069_v58 = vld [vmem:[%s3365_s0 + $0x48] sm:$0xff]  }
 0xc2e   : > { %v1960_v51 = vadd.f32 %v3155_v50, %v1957_v45  ;;  %v1958_v52 = vadd.f32 %v1946_v59, %v1722_v35 }
 0xc2f   : > { %v3629_v62 = vadd.f32 %v2700_v48, %v1962_v60  ;;  %v3070_v60 = vld [vmem:[%s3365_s0 + $0x8] sm:$0xff]  }
 0xc30   : > { %v1961_v55 = vadd.f32 %v3156_v53, %v1958_v52  ;;  %v3622_v57 = vadd.f32 %v2700_v48, %v1960_v51  ;;  %v3067_v53 = vld [vmem:[%s3365_s0 + $0x40] sm:$0xff]  }
 0xc31   : > { %2799 = vmatprep.subr.bf16.mxu1 %v3067_v53 }
 0xc32   : > { %1975 = vadd.xlane.f32.xlu1 %v3622_v57  ;;  %v3626_v61 = vadd.f32 %v2700_v48, %v1961_v55  ;;  %v3068_v55 = vld [vmem:[%s3365_s0] sm:$0xff]  }
 0xc33   : > { %2800 = vmatpush3.bf16.msra.mxu1 %v3068_v55 }
 0xc34   : > { %1977 = vadd.xlane.f32.xlu0 %v3626_v61  ;;  %2801 = vmatprep.subr.bf16.mxu1 %v3069_v58 }
 0xc37   : > { %2802 = vmatpush3.bf16.msra.mxu1 %v3070_v60 }
 0xc38   : > { %1979 = vadd.xlane.f32.xlu0 %v3629_v62  ;;  %2803 = vmatprep.subr.bf16.mxu1 %v3071_v63 }
 0xcbf   : > { %v1976_v3 = vpop.xlane.xlu1 %1975 }
 0xcc0   : > { %v1981_v4 = vmul.f32 0.0078125, %v1976_v3  ;;  %v3076_v3 = vld [vmem:[%s3365_s0 + $0x20] sm:$0xff]  }
 0xcc1   : > { %v1978_v7 = vpop.xlane.xlu0 %1977 }
 0xcc2   : > { %v1984_v9 = vsub.f32 %v3622_v57, %v1981_v4  ;;  %v1982_v10 = vmul.f32 0.0078125, %v1978_v7  ;;  %v3077_v4 = vld [vmem:[%s3365_s0 + $0x68] sm:$0xff]  }
 0xcc3   : > { %v3078_v7 = vld [vmem:[%s3365_s0 + $0x28] sm:$0xff]  }
 0xcc4   : > { %v1985_v11 = vsub.f32 %v3626_v61, %v1982_v10  ;;  %v1987_v12 = vmul.f32 %v1984_v9, %v1984_v9  ;;  %v3080_v10 = vld [vmem:[%s3365_s0 + $0x30] sm:$0xff]  }
 0xcc5   : > { %v1980_v13 = vpop.xlane.xlu0 %1979 }
 0xcc6   : > { %v1983_v14 = vmul.f32 0.0078125, %v1980_v13  ;;  %1990 = vadd.xlane.f32.xlu1 %v1987_v12  ;;  %v1988_v15 = vmul.f32 %v1985_v11, %v1985_v11  ;;  %v3082_v12 = vld [vmem:[%s3365_s0 + $0x38] sm:$0xff]   ;;  %v2042_v13 = vld [vmem:[%s3360_s23] sm:$0x3] }
 0xcc8   : > { %v1986_v30 = vsub.f32 %v3629_v62, %v1983_v14  ;;  %1992 = vadd.xlane.f32.xlu0 %v1988_v15  ;;  %v2049_v14 = vrot.slane %v2042_v13, %v757_v6  ;;  %v2053_v15 = vrot.slane %v2042_v13, %v761_v8 }
 0xcca   : > { %v1989_v16 = vmul.f32 %v1986_v30, %v1986_v30 }
 0xccc   : > { %1994 = vadd.xlane.f32.xlu1 %v1989_v16 }
 0xd53   : > { %v1991_v24 = vpop.xlane.xlu1 %1990 }
 0xd54   : > { %v1996_v25 = vmul.f32 0.0078125, %v1991_v24 }
 0xd55   : > { %v1993_v26 = vpop.xlane.xlu0 %1992 }
 0xd56   : > { %v1999_v27 = vadd.f32 1e-12, %v1996_v25  ;;  %v1997_v28 = vmul.f32 0.0078125, %v1993_v26 }
 0xd58   : > { %3137 = vrsqrt.f32 %v1999_v27  ;;  %v2000_v29 = vadd.f32 1e-12, %v1997_v28 }
 0xd59   : > { %v1995_v33 = vpop.xlane.xlu1 %1994 }
 0xd5a   : > { %3139 = vrsqrt.f32 %v2000_v29  ;;  %v1998_v34 = vmul.f32 0.0078125, %v1995_v33 }
 0xd5c   : > { %v2001_v35 = vadd.f32 1e-12, %v1998_v34 }
 0xd5e   : > { %3141 = vrsqrt.f32 %v2001_v35 }
 0xd62   : > { %v3138_v37 = vpop.eup %3137 }
 0xd63   : > { %v2005_v49 = vmul.f32 %v3138_v37, %v1984_v9  ;;  %v3079_v9 = vld [vmem:[%s3365_s0 + $0x70] sm:$0xff]  }
 0xd64   : > { %v3140_v40 = vpop.eup %3139 }
 0xd65   : > { %v2006_v42 = vmul.f32 %v3140_v40, %v1985_v11  ;;  %v2014_v43 = vmul.f32 %v2701_v39, %v2005_v49  ;;  %v3081_v11 = vld [vmem:[%s3365_s0 + $0x78] sm:$0xff]  }
 0xd67   : > { %v2015_v56 = vmul.f32 %v2701_v39, %v2006_v42  ;;  %v2023_v45 = vadd.f32 %v2702_v54, %v2014_v43 }
 0xd68   : > { %v3142_v44 = vpop.eup %3141 }
 0xd69   : > { %v2024_v47 = vadd.f32 %v2702_v54, %v2015_v56  ;;  %v2007_v59 = vmul.f32 %v3142_v44, %v1986_v30 }
 0xd6b   : > { %v2043_v48 = vpack.c.bf16 %v2024_v47, %v2023_v45  ;;  %v2016_v50 = vmul.f32 %v2701_v39, %v2007_v59 }
 0xd6d   : > { %2169 = vmatmul.mubr.bf16.vlgmr.msra.gmra.mrb[28].mxu0 %v2043_v48  ;;  %v2025_v51 = vadd.f32 %v2702_v54, %v2016_v50 }
 0xd6e   : > { %2178 = vmatprep.mubr.bf16.mxu0 %v3198_v38  ;;  %v3072_v38 = vld [vmem:[%s3365_s0 + $0x10] sm:$0xff]  }
 0xd6f   : > { %v2044_v52 = vpack.c.bf16 %v2025_v51, %v2025_v51  ;;  %2804 = vmatpush3.bf16.msra.mxu1 %v3072_v38 }
 0xd70   : > { %2805 = vmatprep.subr.bf16.mxu1 %v3073_v0 }
 0xd73   : > { %2806 = vmatpush3.bf16.msra.mxu1 %v3074_v1 }
 0xd74   : > { %2807 = vmatprep.subr.bf16.mxu1 %v3075_v2 }
 0xd75   : > { %2179 = vmatmul.mubr.bf16.gmra.mrb[32].mxu0 %v2044_v52 }
 0xd77   : > { %2808 = vmatpush3.bf16.msra.mxu1 %v3076_v3 }
 0xd78   : > { %2809 = vmatprep.subr.bf16.mxu1 %v3077_v4 }
 0xd7b   : > { %2810 = vmatpush3.bf16.msra.mxu1 %v3078_v7 }
 0xd7c   : > { %2811 = vmatprep.subr.bf16.mxu1 %v3079_v9 }
 0xd7f   : > { %2812 = vmatpush3.bf16.msra.mxu1 %v3080_v10 }
 0xd80   : > { %2813 = vmatprep.subr.bf16.mxu1 %v3081_v11 }
 0xd83   : > { %2814 = vmatpush3.bf16.msra.mxu1 %v3082_v12 }
 0xe40   : > { %v2170_v30 = vpop.f32.mrb[28].mxu0 }
 0xe41   : > { %v2171_v16 = vadd.f32 %v2170_v30, %v2049_v14  ;;  %v2172_v41 = vpop.f32.mrb[29].mxu0 }
 0xe42   : > { %v2173_v31 = vadd.f32 %v2172_v41, %v2053_v15  ;;  %v2174_v17 = vpop.f32.mrb[30].mxu0 }
 0xe43   : > { %v2187_v18 = vmul.f32 %v2171_v16, %v2171_v16  ;;  %v2175_v32 = vadd.f32 %v2174_v17, %v2049_v14  ;;  %v2176_v46 = vpop.f32.mrb[31].mxu0 }
 0xe44   : > { %v2188_v36 = vmul.f32 %v2173_v31, %v2173_v31  ;;  %v2177_v19 = vadd.f32 %v2176_v46, %v2053_v15 }
 0xe45   : > { %v2193_v20 = vmul.f32 %v2187_v18, %v2171_v16  ;;  %v2189_v21 = vmul.f32 %v2175_v32, %v2175_v32 }
 0xe46   : > { %v2194_v22 = vmul.f32 %v2188_v36, %v2173_v31  ;;  %v2190_v23 = vmul.f32 %v2177_v19, %v2177_v19 }
 0xe47   : > { %v2199_v24 = vmul.f32 0.044715, %v2193_v20  ;;  %v2195_v25 = vmul.f32 %v2189_v21, %v2175_v32 }
 0xe48   : > { %v2200_v6 = vmul.f32 0.044715, %v2194_v22  ;;  %v2196_v26 = vmul.f32 %v2190_v23, %v2177_v19  ;;  %v2180_v5 = vpop.f32.mrb[32].mxu0 }
 0xe49   : > { %v2205_v8 = vadd.f32 %v2199_v24, %v2171_v16  ;;  %v2201_v27 = vmul.f32 0.044715, %v2195_v25  ;;  %v2181_v28 = vadd.f32 %v2180_v5, %v2049_v14  ;;  %v2182_v29 = vpop.f32.mrb[33].mxu0 }
 0xe4a   : > { %v2206_v33 = vadd.f32 %v2200_v6, %v2173_v31  ;;  %v2202_v34 = vmul.f32 0.044715, %v2196_v26  ;;  %v2183_v35 = vadd.f32 %v2182_v29, %v2053_v15  ;;  %v2184_v37 = vpop.f32.mrb[34].mxu0 }
 0xe4b   : > { %v2211_v39 = vmul.f32 0.7978846, %v2205_v8  ;;  %v2207_v49 = vadd.f32 %v2201_v27, %v2175_v32  ;;  %v2191_v40 = vmul.f32 %v2181_v28, %v2181_v28  ;;  %v2185_v42 = vpop.f32.mrb[35].mxu0 }
 0xe4c   : > { %v2212_v43 = vmul.f32 0.7978846, %v2206_v33  ;;  %v2208_v54 = vadd.f32 %v2202_v34, %v2177_v19  ;;  %v2192_v56 = vmul.f32 %v2183_v35, %v2183_v35 }
 0xe4d   : > { %3143 = vtanh.f32 %v2211_v39  ;;  %v2213_v44 = vmul.f32 0.7978846, %v2207_v49  ;;  %v2197_v45 = vmul.f32 %v2191_v40, %v2181_v28 }
 0xe4e   : > { %3145 = vtanh.f32 %v2212_v43  ;;  %v2214_v47 = vmul.f32 0.7978846, %v2208_v54  ;;  %v2198_v59 = vmul.f32 %v2192_v56, %v2183_v35 }
 0xe4f   : > { %3147 = vtanh.f32 %v2213_v44  ;;  %v2203_v48 = vmul.f32 0.044715, %v2197_v45 }
 0xe50   : > { %3149 = vtanh.f32 %v2214_v47  ;;  %v2204_v50 = vmul.f32 0.044715, %v2198_v59 }
 0xe51   : > { %v2209_v51 = vadd.f32 %v2203_v48, %v2181_v28 }
 0xe52   : > { %v2210_v52 = vadd.f32 %v2204_v50, %v2183_v35 }
 0xe53   : > { %v2215_v53 = vmul.f32 0.7978846, %v2209_v51 }
 0xe54   : > { %v2216_v55 = vmul.f32 0.7978846, %v2210_v52 }
 0xe55   : > { %3151 = vtanh.f32 %v2215_v53 }
 0xe56   : > { %3153 = vtanh.f32 %v2216_v55 }
 0xe57   : > { %v3144_v58 = vpop.eup %3143 }
 0xe58   : > { %v3146_v60 = vpop.eup %3145  ;;  %v2223_v63 = vadd.f32 1.0, %v3144_v58 }
 0xe59   : > { %v3148_v38 = vpop.eup %3147  ;;  %v2224_v0 = vadd.f32 1.0, %v3146_v60 }
 0xe5a   : > { %v3150_v1 = vpop.eup %3149  ;;  %v2229_v2 = vmul.f32 0.5, %v2223_v63  ;;  %v2225_v3 = vadd.f32 1.0, %v3148_v38 }
 0xe5b   : > { %v2226_v4 = vadd.f32 1.0, %v3150_v1  ;;  %v2230_v7 = vmul.f32 0.5, %v2224_v0 }
 0xe5c   : > { %v2231_v9 = vmul.f32 0.5, %v2225_v3  ;;  %v2235_v11 = vmul.f32 %v2229_v2, %v2171_v16 }
 0xe5d   : > { %v2232_v10 = vmul.f32 0.5, %v2226_v4  ;;  %v2236_v14 = vmul.f32 %v2230_v7, %v2173_v31 }
 0xe5e   : > { %v2237_v12 = vmul.f32 %v2231_v9, %v2175_v32  ;;  %v2719_v32 = vld [vmem:[%s645_s30] ss:$0 sm:$0xff] }
 0xe5f   : > { %v3152_v13 = vpop.eup %3151  ;;  %v2238_v15 = vmul.f32 %v2232_v10, %v2177_v19 }
 0xe60   : > { %v3154_v30 = vpop.eup %3153  ;;  %v2274_v41 = vpack.c.bf16 %v2237_v12, %v2235_v11  ;;  %v2227_v17 = vadd.f32 1.0, %v3152_v13 }
 0xe61   : > { %v2275_v18 = vpack.c.bf16 %v2238_v15, %v2236_v14  ;;  %v2228_v46 = vadd.f32 1.0, %v3154_v30 }
 0xe62   : > { %v2233_v36 = vmul.f32 0.5, %v2227_v17 }
 0xe63   : > { %2412 = vmatprep.mubr.bf16.mxu1 %v2275_v18  ;;  %v2234_v20 = vmul.f32 0.5, %v2228_v46 }
 0xe64   : > { %2413 = vmatmul.mubr.bf16.vlgmr.msra.gmra.mrb[32].mxu1 %v2274_v41  ;;  %v2239_v22 = vmul.f32 %v2233_v36, %v2181_v28 }
 0xe65   : > { %v2240_v21 = vmul.f32 %v2234_v20, %v2183_v35 }
 0xe66   : > { %v2276_v16 = vpack.c.bf16 %v2239_v22, %v2239_v22 }
 0xe67   : > { %v2277_v23 = vpack.c.bf16 %v2240_v21, %v2240_v21 }
 0xe69   : > { %2420 = vmatprep.mubr.bf16.mxu1 %v2277_v23 }
 0xe6c   : > { %2421 = vmatmul.mubr.bf16.gmra.mrb[36].mxu1 %v2276_v16 }
 0xf37   : > { %v2815_v31 = vpop.f32.mrb[32].mxu1 }
 0xf38   : > { %v2816_v19 = vpop.f32.mrb[33].mxu1 }
 0xf39   : > { %v2817_v24 = vadd.f32 %v2816_v19, %v2815_v31  ;;  %v2818_v25 = vpop.f32.mrb[34].mxu1 }
 0xf3a   : > { %v2819_v6 = vpop.f32.mrb[35].mxu1 }
 0xf3b   : > { %v2415_v26 = vadd.f32 %v2817_v24, %v2719_v32  ;;  %v2820_v5 = vadd.f32 %v2819_v6, %v2818_v25 }
 0xf3d   : > { %v2428_v8 = vadd.f32 %v2415_v26, %v3622_v57  ;;  %v2418_v27 = vadd.f32 %v2820_v5, %v2719_v32 }
 0xf3f   : > { %2431 = vst [vmem:[%s3374_s5] sm:$0xff] %v2428_v8  ;;  %v2429_v28 = vadd.f32 %v2418_v27, %v3626_v61  ;;  %v2821_v29 = vpop.f32.mrb[36].mxu1 }
 0xf40   : > { %v2822_v33 = vpop.f32.mrb[37].mxu1 }
 0xf41   : > { %2432 = vst [vmem:[%s3374_s5 + $0x8] sm:$0xff] %v2429_v28  ;;  %v2823_v34 = vadd.f32 %v2822_v33, %v2821_v29  ;;  %v2824_v35 = vpop.f32.mrb[38].mxu1 }
 0xf42   : > { %v2825_v37 = vpop.f32.mrb[39].mxu1 }
 0xf43   : > { %v2423_v39 = vadd.f32 %v2823_v34, %v2719_v32 }
 0xf45   : > { %v2430_v49 = vadd.f32 %v2423_v39, %v3629_v62 }
 0xf47   : > { %2433 = vst [vmem:[%s3374_s5 + $0x10] sm:$0xff] %v2430_v49 }
 0xf48 PF: > { %s3752_s15 = sld [smem:[#allocation5_spill]]  ;;  %s3753_s25 = sld [smem:[#allocation3_spill]] }
 0xf49   : > { %s3754_s26 = sld [smem:[#allocation4_spill]]  ;;  %s3755_s27 = sld [smem:[#allocation6_spill]] }
 0xf4a   : > { %s3756_s28 = sld [smem:[#allocation7_spill]] }
 0xf4e   : > { %s23_s29 = sadd.s32 1, %s3752_s15  }
 0xf4f   : > { %p20_p8 = scmp.ge.s32.totalorder %s23_s29, 6  }
 0xf51   :  { %22 = sbr.rel (!%p20_p8) target bundleno = 7 (0x7), region = 142 }

</bundles_post_ra>
